<compile_context>
chip_gen: v7x
topology: tpu7x:2x2x1
jax: 0.10.0
libtpu: 0.0.40
codegen_flags: <defaults>
</compile_context>

<pallas_src>
import jax
import jax.numpy as jnp
from jax.experimental import pallas as pl
from jax.experimental.pallas import tpu as pltpu


_NEG_BIG = -1.0e30  # finite "-inf" for masked instance logits (avoids inf-inf NaNs)


def _abmil_pool_kernel(n_valid_ref, x_ref, wvu_ref, bvu_ref, ww_ref,
                       pooled_ref, m_sc, l_sc, acc_sc):
    """One (batch b, instance-tile n) step of online-softmax gated-ABMIL pooling."""
    n_idx = pl.program_id(1)
    tile_n = x_ref.shape[0]
    L = ww_ref.shape[1]

    @pl.when(n_idx == 0)
    def _init():
        m_sc[...] = jnp.full_like(m_sc, -jnp.inf)
        l_sc[...] = jnp.zeros_like(l_sc)
        acc_sc[...] = jnp.zeros_like(acc_sc)

    x = x_ref[...]                                                   # [tile_n, D] bf16

    # Fused gated projections Wv|Wu: one bf16 MXU pass over the tile, f32 accumulate.
    vu = jnp.dot(x, wvu_ref[...], preferred_element_type=jnp.float32) + bvu_ref[...]
    v = jnp.tanh(vu[:, :L])                                          # EUP
    u = 0.5 * (jnp.tanh(0.5 * vu[:, L:]) + 1.0)                      # sigmoid via 1 tanh

    # Attention logits: VPU multiply + lane reduce (no width-1 MXU matmul).
    # (bw omitted: softmax is shift-invariant, so it cancels exactly.)
    s = jnp.sum((v * u) * ww_ref[...], axis=-1, keepdims=True)       # [tile_n, 1] f32

    # Mask padded instances (ragged N padded up to a multiple of tile_n in the wrapper).
    row = n_idx * tile_n + jax.lax.broadcasted_iota(jnp.int32, (tile_n, 1), 0)
    s = jnp.where(row < n_valid_ref[0], s, _NEG_BIG)

    # Online-softmax (running-rescale) update.
    m_prev = m_sc[...]                                               # [1, 1]
    m_new = jnp.maximum(m_prev, jnp.max(s, axis=0, keepdims=True))   # [1, 1]
    alpha = jnp.exp(m_prev - m_new)                                  # [1, 1]
    p = jnp.exp(s - m_new)                                           # [tile_n, 1] f32
    l_sc[...] = alpha * l_sc[...] + jnp.sum(p, axis=0, keepdims=True)

    # Pooling on the VPU/XLU (MXU stays dedicated to x @ Wvu): broadcast p across lanes,
    # multiply with x, sublane-reduce into the lane-dense f32 [1, D] accumulator.
    acc_sc[...] = alpha * acc_sc[...] + jnp.sum(x.astype(jnp.float32) * p,
                                                axis=0, keepdims=True)
    m_sc[...] = m_new

    @pl.when(n_idx == pl.num_programs(1) - 1)
    def _finalize():
        pooled = acc_sc[...] * pl.reciprocal(l_sc[...], approx=False)   # [1, D]
        pooled_ref[...] = pooled.astype(pooled_ref.dtype)


def _generation_budgets():
    """(vmem_limit_bytes, x-tile double-buffer budget) chosen per TPU generation."""
    try:
        vmem_cap = pltpu.get_tpu_info().vmem_capacity_bytes
    except Exception:  # pragma: no cover - conservative fallback if query unavailable
        vmem_cap = 128 << 20
    if vmem_cap <= (64 << 20):          # v7x-class: 64 MiB physical per TensorCore
        return 48 << 20, 16 << 20
    return 96 << 20, 28 << 20           # v5e / v6e: 128 MiB physical


def _pick_tile_n(n, d, itemsize, budget_bytes):
    """Largest 256-aligned instance tile (min 128) whose double-buffered slab fits budget."""
    rows = int(budget_bytes // (2 * d * itemsize))   # rows per buffer, double-buffered
    rows = min(rows, 8192)
    rows = (rows // 256) * 256 if rows >= 256 else 128
    n_rounded = (-(-n // 128)) * 128                 # no point tiling beyond the padded bag
    return int(max(128, min(rows, n_rounded)))


def binary_multimodal_forward(x_img, x_gene, params, *, tile_n=None, x_buffer_count=None):
    """x_img: [B, N, D] (cast to bf16), x_gene: [B, G].  Returns logits [B] (f32)."""
    B, N, D = x_img.shape
    L = params["ww"].shape[1]
    x_img = x_img.astype(jnp.bfloat16)          # bf16 MXU operand / half the HBM traffic

    vmem_limit, x_budget = _generation_budgets()
    if tile_n is None:
        tile_n = _pick_tile_n(N, D, 2, x_budget)
    if tile_n % 128 != 0:
        raise ValueError(f"tile_n={tile_n} must be a multiple of 128")

    # Ragged bags: pad instances up to a multiple of tile_n; kernel masks padded rows.
    n_pad = int(pl.cdiv(N, tile_n)) * tile_n
    if n_pad != N:
        x_img = jnp.pad(x_img, ((0, 0), (0, n_pad - N), (0, 0)))
    n_valid = jnp.array([N], dtype=jnp.int32)

    grid = (B, n_pad // tile_n)

    cost = pl.CostEstimate(
        flops=int(2 * B * n_pad * D * (2 * L)       # fused gated projection (MXU)
                  + 6 * B * n_pad * L               # gate product + logit reduce (VPU)
                  + 3 * B * n_pad * D),             # VPU pooling multiply + reduce
        transcendentals=int(2 * B * n_pad * L),     # tanh for v and u gates
        bytes_accessed=int(B * n_pad * D * 2 + D * 2 * L * 2
                           + 3 * L * 4 + B * D * 4 + 4),
    )

    x_spec_kwargs = {}
    if x_buffer_count is not None:                  # optional Buffered(3) sweep (v6e mem-bound)
        x_spec_kwargs["pipeline_mode"] = pl.Buffered(x_buffer_count)

    # TODO(synk): on v7x with B==1, shard the instance reduction across the two
    # TensorCores (grid (B, 2, NT/2), per-core (m, l, acc) + tiny wrapper merge).
    pooled = pl.pallas_call(
        _abmil_pool_kernel,
        out_shape=jax.ShapeDtypeStruct((B, 1, D), jnp.float32),
        grid_spec=pltpu.PrefetchScalarGridSpec(
            num_scalar_prefetch=1,                  # n_valid -> SMEM
            grid=grid,
            in_specs=[
                pl.BlockSpec((None, tile_n, D), lambda b, n, nv: (b, n, 0),
                             **x_spec_kwargs),                          # x_img tile (bf16)
                # TODO(synk): single-buffer these constant-index weights (pl.Buffered(1)
                # or one-shot DMA into scratch) to free ~|w_vu| of VMEM on v7x.
                pl.BlockSpec((D, 2 * L), lambda b, n, nv: (0, 0)),      # fused Wv|Wu (bf16)
                pl.BlockSpec((1, 2 * L), lambda b, n, nv: (0, 0)),      # bv|bu       (f32)
                pl.BlockSpec((1, L), lambda b, n, nv: (0, 0)),          # Ww row      (f32)
            ],
            out_specs=pl.BlockSpec((None, 1, D), lambda b, n, nv: (b, 0, 0)),
            scratch_shapes=[
                pltpu.VMEM((1, 1), jnp.float32),   # running max m
                pltpu.VMEM((1, 1), jnp.float32),   # running denom l
                pltpu.VMEM((1, D), jnp.float32),   # running pooled accumulator
            ],
        ),
        compiler_params=pltpu.CompilerParams(
            dimension_semantics=("parallel", "arbitrary"),
            vmem_limit_bytes=vmem_limit,
        ),
        cost_estimate=cost,
    )(n_valid, x_img, params["w_vu"], params["b_vu"], params["ww"])

    # Classifier head hoisted out of the kernel: batched M=B matmuls in XLA (f32).
    pooled = pooled[:, 0, :].astype(jnp.float32)                               # [B, D]
    h = (pooled @ params["w1_img"]
         + x_gene.astype(jnp.float32) @ params["w1_gene"]
         + params["b1"])                                                       # [B, H]
    h = jax.nn.relu(h)
    logits = h @ params["w2"].T + params["b2"]                                 # [B, 1]
    return logits[:, 0]                                                        # squeeze(1)


def init_params(key, input_feature_dim, genomic_dim, head_dim, hidden_dim):
    """Deterministic synthetic params. MXU weight stored bf16; everything else f32."""
    D, G, L, H = input_feature_dim, genomic_dim, head_dim, hidden_dim
    ks = jax.random.split(key, 9)
    s = 0.05
    f32 = jnp.float32
    return {
        # gated ABMIL attention: Wv and Wu fused along the output axis -> [D, 2L]
        "w_vu": (s * jax.random.normal(ks[0], (D, 2 * L), f32)).astype(jnp.bfloat16),
        "b_vu": s * jax.random.normal(ks[1], (1, 2 * L), f32),
        "ww": s * jax.random.normal(ks[2], (1, L), f32),
        "bw": s * jax.random.normal(ks[3], (1, 1), f32),   # cancels in softmax (kept for parity)
        # classifier: Linear(D+G, H) split into image and genomic halves (wrapper-side)
        "w1_img": s * jax.random.normal(ks[4], (D, H), f32),
        "w1_gene": s * jax.random.normal(ks[5], (G, H), f32),
        "b1": s * jax.random.normal(ks[6], (1, H), f32),
        "w2": s * jax.random.normal(ks[7], (1, H), f32),   # Linear(H, 1) weight as a row
        "b2": s * jax.random.normal(ks[8], (1, 1), f32),
    }


def reference_forward(x_img, x_gene, p):
    """Pure-JAX f32 reference mirroring the PyTorch forward (for self-check)."""
    x = x_img.astype(jnp.float32)
    L = p["ww"].shape[1]
    vu = x @ p["w_vu"].astype(jnp.float32) + p["b_vu"]
    v = jnp.tanh(vu[..., :L])
    u = jax.nn.sigmoid(vu[..., L:])
    a_logits = jnp.sum((v * u) * p["ww"], axis=-1) + p["bw"][0, 0]      # [B, N]
    a = jax.nn.softmax(a_logits, axis=-1)
    pooled = jnp.einsum("bn,bnd->bd", a, x)                             # [B, D]
    w1 = jnp.concatenate([p["w1_img"], p["w1_gene"]], axis=0)
    combined = jnp.concatenate([pooled, x_gene.astype(jnp.float32)], axis=1)
    h = jax.nn.relu(combined @ w1 + p["b1"])
    logits = h @ p["w2"].T + p["b2"]                                    # [B, 1]
    return logits[:, 0]


if __name__ == "__main__":
    # Small shapes consistent with the module (scaled-down defaults D=1024, head_dim=512,
    # hidden=256, G=4): B=2 bags, N=500 instances (ragged -> exercises pad+mask),
    # D=256 features, G=4 genomic features, attention head_dim L=128, hidden H=128.
    B, N, D, G, L, H = 2, 500, 256, 4, 128, 128

    key = jax.random.PRNGKey(0)
    k_img, k_gene, k_par = jax.random.split(key, 3)
    x_img = jax.random.normal(k_img, (B, N, D), jnp.float32).astype(jnp.bfloat16)
    x_gene = jax.random.normal(k_gene, (B, G), jnp.float32)
    params = init_params(k_par, D, G, L, H)

    ref = reference_forward(x_img, x_gene, params)

    # Multi-tile path: tile_n=128 -> grid (B, 4), last tile has 12 masked padded rows.
    logits = binary_multimodal_forward(x_img, x_gene, params, tile_n=128)
    logits = jax.block_until_ready(logits)
    assert logits.shape == (B,)
    assert jnp.allclose(logits, ref, atol=1e-2, rtol=5e-2), (logits, ref)

    # Auto-tiled path: generation-aware budget picks a single 512-row tile for N=500.
    logits2 = binary_multimodal_forward(x_img, x_gene, params)
    logits2 = jax.block_until_ready(logits2)
    assert jnp.allclose(logits2, ref, atol=1e-2, rtol=5e-2), (logits2, ref)

    print("KERNEL_OK")
</pallas_src>

<mosaic_0001>
module attributes {stable_mosaic.version = 11 : i64} {
  func.func @_abmil_pool_kernel(%arg0: i32, %arg1: i32, %arg2: memref<1xi32, #tpu.memory_space<smem>>, %arg3: memref<1x128x256xbf16, #tpu.memory_space<vmem>>, %arg4: memref<256x256xbf16, #tpu.memory_space<vmem>>, %arg5: memref<1x256xf32, #tpu.memory_space<vmem>>, %arg6: memref<1x128xf32, #tpu.memory_space<vmem>>, %arg7: memref<1x1x256xf32, #tpu.memory_space<vmem>>, %arg8: memref<1x1xf32, #tpu.memory_space<vmem>>, %arg9: memref<1x1xf32, #tpu.memory_space<vmem>>, %arg10: memref<1x256xf32, #tpu.memory_space<vmem>>) attributes {dimension_semantics = [#tpu.dimension_semantics<parallel>, #tpu.dimension_semantics<arbitrary>], iteration_bounds = array<i64: 2, 4>, scalar_prefetch = 1 : i64, scratch_operands = 3 : i64, tpu.core_type = #tpu.core_type<tc>, window_params = [{transform_indices = @transform_0, window_bounds = array<i64: 1, 128, 256>}, {pipeline_mode = #tpu.pipeline_mode<synchronous>, transform_indices = @transform_1, window_bounds = array<i64: 256, 256>}, {pipeline_mode = #tpu.pipeline_mode<synchronous>, transform_indices = @transform_2, window_bounds = array<i64: 1, 256>}, {pipeline_mode = #tpu.pipeline_mode<synchronous>, transform_indices = @transform_3, window_bounds = array<i64: 1, 128>}, {transform_indices = @transform_4, window_bounds = array<i64: 1, 1, 256>}]} {
    %c0_i32 = arith.constant 0 : i32
    %0 = arith.cmpi eq, %arg1, %c0_i32 : i32
    %1 = arith.extui %0 : i1 to i32
    %c0_i32_0 = arith.constant 0 : i32
    %2 = arith.cmpi ne, %1, %c0_i32_0 : i32
    scf.if %2 {
      %cst_31 = arith.constant 0xFF800000 : f32
      %64 = vector.broadcast %cst_31 : f32 to vector<1x1xf32>
      %c0_32 = arith.constant 0 : index
      %c0_33 = arith.constant 0 : index
      %65 = vector.load %arg8[%c0_32, %c0_33] : memref<1x1xf32, #tpu.memory_space<vmem>>, vector<1x1xf32>
      tpu.vector_store %arg8[%c0_32, %c0_33], %64 {strides = array<i32>} : memref<1x1xf32, #tpu.memory_space<vmem>>, vector<1x1xf32>,
      %cst_34 = arith.constant 0.000000e+00 : f32
      %66 = vector.broadcast %cst_34 : f32 to vector<1x1xf32>
      %c0_35 = arith.constant 0 : index
      %c0_36 = arith.constant 0 : index
      %67 = vector.load %arg9[%c0_35, %c0_36] : memref<1x1xf32, #tpu.memory_space<vmem>>, vector<1x1xf32>
      tpu.vector_store %arg9[%c0_35, %c0_36], %66 {strides = array<i32>} : memref<1x1xf32, #tpu.memory_space<vmem>>, vector<1x1xf32>,
      %cst_37 = arith.constant 0.000000e+00 : f32
      %68 = vector.broadcast %cst_37 : f32 to vector<1x256xf32>
      %c0_38 = arith.constant 0 : index
      %c0_39 = arith.constant 0 : index
      %69 = vector.load %arg10[%c0_38, %c0_39] : memref<1x256xf32, #tpu.memory_space<vmem>>, vector<1x256xf32>
      tpu.vector_store %arg10[%c0_38, %c0_39], %68 {strides = array<i32>} : memref<1x256xf32, #tpu.memory_space<vmem>>, vector<1x256xf32>,
    } else {
    }
    %c0 = arith.constant 0 : index
    %c0_1 = arith.constant 0 : index
    %c0_2 = arith.constant 0 : index
    %3 = vector.load %arg3[%c0, %c0_1, %c0_2] : memref<1x128x256xbf16, #tpu.memory_space<vmem>>, vector<1x128x256xbf16>
    %4 = vector.shape_cast %3 : vector<1x128x256xbf16> to vector<128x256xbf16>
    %c0_3 = arith.constant 0 : index
    %c0_4 = arith.constant 0 : index
    %5 = vector.load %arg4[%c0_3, %c0_4] : memref<256x256xbf16, #tpu.memory_space<vmem>>, vector<256x256xbf16>
    %cst = arith.constant dense<0.000000e+00> : vector<128x256xf32>
    %6 = tpu.matmul %4, %5, %cst {dimension_numbers = #tpu.dot_dimension_numbers<[1], [0], [0], [1], [0, 0, 1, 1], [], []>} : vector<128x256xbf16>, vector<256x256xbf16>, vector<128x256xf32> -> vector<128x256xf32>
    %c0_5 = arith.constant 0 : index
    %c0_6 = arith.constant 0 : index
    %7 = vector.load %arg5[%c0_5, %c0_6] : memref<1x256xf32, #tpu.memory_space<vmem>>, vector<1x256xf32>
    %8 = vector.broadcast %7 : vector<1x256xf32> to vector<128x256xf32>
    %9 = arith.addf %6, %8 : vector<128x256xf32>
    %10 = vector.extract_strided_slice %9 {offsets = [0, 0], sizes = [128, 128], strides = [1, 1]} : vector<128x256xf32> to vector<128x128xf32>
    %11 = math.tanh %10 : vector<128x128xf32>
    %12 = vector.extract_strided_slice %9 {offsets = [0, 128], sizes = [128, 128], strides = [1, 1]} : vector<128x256xf32> to vector<128x128xf32>
    %cst_7 = arith.constant 5.000000e-01 : f32
    %13 = vector.broadcast %cst_7 : f32 to vector<128x128xf32>
    %14 = arith.mulf %13, %12 : vector<128x128xf32>
    %15 = math.tanh %14 : vector<128x128xf32>
    %cst_8 = arith.constant 1.000000e+00 : f32
    %16 = vector.broadcast %cst_8 : f32 to vector<128x128xf32>
    %17 = arith.addf %15, %16 : vector<128x128xf32>
    %cst_9 = arith.constant 5.000000e-01 : f32
    %18 = vector.broadcast %cst_9 : f32 to vector<128x128xf32>
    %19 = arith.mulf %18, %17 : vector<128x128xf32>
    %20 = arith.mulf %11, %19 : vector<128x128xf32>
    %c0_10 = arith.constant 0 : index
    %c0_11 = arith.constant 0 : index
    %21 = vector.load %arg6[%c0_10, %c0_11] : memref<1x128xf32, #tpu.memory_space<vmem>>, vector<1x128xf32>
    %22 = vector.broadcast %21 : vector<1x128xf32> to vector<128x128xf32>
    %23 = arith.mulf %20, %22 : vector<128x128xf32>
    %cst_12 = arith.constant dense<0.000000e+00> : vector<128xf32>
    %24 = vector.multi_reduction <add>, %23, %cst_12 [1] : vector<128x128xf32> to vector<128xf32>
    %25 = vector.shape_cast %24 : vector<128xf32> to vector<128x1xf32>
    %c128_i32 = arith.constant 128 : i32
    %26 = arith.muli %arg1, %c128_i32 : i32
    %27 = tpu.iota {dimensions = array<i32: 0>} : vector<128x1xi32>
    %28 = vector.broadcast %26 : i32 to vector<128x1xi32>
    %29 = arith.addi %28, %27 : vector<128x1xi32>
    %c0_13 = arith.constant 0 : index
    %30 = memref.load %arg2[%c0_13] : memref<1xi32, #tpu.memory_space<smem>>
    %31 = vector.broadcast %30 : i32 to vector<128x1xi32>
    %32 = arith.cmpi slt, %29, %31 : vector<128x1xi32>
    %cst_14 = arith.constant -1.000000e+30 : f32
    %33 = vector.broadcast %cst_14 : f32 to vector<128x1xf32>
    %34 = arith.select %32, %25, %33 : vector<128x1xi1>, vector<128x1xf32>
    %c0_15 = arith.constant 0 : index
    %c0_16 = arith.constant 0 : index
    %35 = vector.load %arg8[%c0_15, %c0_16] : memref<1x1xf32, #tpu.memory_space<vmem>>, vector<1x1xf32>
    %cst_17 = arith.constant dense<0xFF800000> : vector<1xf32>
    %36 = vector.multi_reduction <maximumf>, %34, %cst_17 [0] : vector<128x1xf32> to vector<1xf32>
    %37 = vector.shape_cast %36 : vector<1xf32> to vector<1x1xf32>
    %38 = arith.maximumf %35, %37 : vector<1x1xf32>
    %39 = arith.subf %35, %38 : vector<1x1xf32>
    %40 = math.exp %39 : vector<1x1xf32>
    %41 = vector.broadcast %38 : vector<1x1xf32> to vector<128x1xf32>
    %42 = arith.subf %34, %41 : vector<128x1xf32>
    %43 = math.exp %42 : vector<128x1xf32>
    %c0_18 = arith.constant 0 : index
    %c0_19 = arith.constant 0 : index
    %44 = vector.load %arg9[%c0_18, %c0_19] : memref<1x1xf32, #tpu.memory_space<vmem>>, vector<1x1xf32>
    %45 = arith.mulf %40, %44 : vector<1x1xf32>
    %cst_20 = arith.constant dense<0.000000e+00> : vector<1xf32>
    %46 = vector.multi_reduction <add>, %43, %cst_20 [0] : vector<128x1xf32> to vector<1xf32>
    %47 = vector.shape_cast %46 : vector<1xf32> to vector<1x1xf32>
    %48 = arith.addf %45, %47 : vector<1x1xf32>
    %c0_21 = arith.constant 0 : index
    %c0_22 = arith.constant 0 : index
    %49 = vector.load %arg9[%c0_21, %c0_22] : memref<1x1xf32, #tpu.memory_space<vmem>>, vector<1x1xf32>
    tpu.vector_store %arg9[%c0_21, %c0_22], %48 {strides = array<i32>} : memref<1x1xf32, #tpu.memory_space<vmem>>, vector<1x1xf32>,
    %c0_23 = arith.constant 0 : index
    %c0_24 = arith.constant 0 : index
    %50 = vector.load %arg10[%c0_23, %c0_24] : memref<1x256xf32, #tpu.memory_space<vmem>>, vector<1x256xf32>
    %51 = vector.broadcast %40 : vector<1x1xf32> to vector<1x256xf32>
    %52 = arith.mulf %51, %50 : vector<1x256xf32>
    %53 = arith.extf %4 : vector<128x256xbf16> to vector<128x256xf32>
    %54 = vector.broadcast %43 : vector<128x1xf32> to vector<128x256xf32>
    %55 = arith.mulf %53, %54 : vector<128x256xf32>
    %cst_25 = arith.constant dense<0.000000e+00> : vector<256xf32>
    %56 = vector.multi_reduction <add>, %55, %cst_25 [0] : vector<128x256xf32> to vector<256xf32>
    %57 = vector.shape_cast %56 : vector<256xf32> to vector<1x256xf32>
    %58 = arith.addf %52, %57 : vector<1x256xf32>
    %c0_26 = arith.constant 0 : index
    %c0_27 = arith.constant 0 : index
    %59 = vector.load %arg10[%c0_26, %c0_27] : memref<1x256xf32, #tpu.memory_space<vmem>>, vector<1x256xf32>
    tpu.vector_store %arg10[%c0_26, %c0_27], %58 {strides = array<i32>} : memref<1x256xf32, #tpu.memory_space<vmem>>, vector<1x256xf32>,
    %c0_28 = arith.constant 0 : index
    %c0_29 = arith.constant 0 : index
    %60 = vector.load %arg8[%c0_28, %c0_29] : memref<1x1xf32, #tpu.memory_space<vmem>>, vector<1x1xf32>
    tpu.vector_store %arg8[%c0_28, %c0_29], %38 {strides = array<i32>} : memref<1x1xf32, #tpu.memory_space<vmem>>, vector<1x1xf32>,
    %c3_i32 = arith.constant 3 : i32
    %61 = arith.cmpi eq, %arg1, %c3_i32 : i32
    %62 = arith.extui %61 : i1 to i32
    %c0_i32_30 = arith.constant 0 : i32
    %63 = arith.cmpi ne, %62, %c0_i32_30 : i32
    scf.if %63 {
      %c0_31 = arith.constant 0 : index
      %c0_32 = arith.constant 0 : index
      %64 = vector.load %arg10[%c0_31, %c0_32] : memref<1x256xf32, #tpu.memory_space<vmem>>, vector<1x256xf32>
      %c0_33 = arith.constant 0 : index
      %c0_34 = arith.constant 0 : index
      %65 = vector.load %arg9[%c0_33, %c0_34] : memref<1x1xf32, #tpu.memory_space<vmem>>, vector<1x1xf32>
      %66 = tpu.reciprocal %65 : vector<1x1xf32> -> vector<1x1xf32>
      %67 = vector.broadcast %66 : vector<1x1xf32> to vector<1x256xf32>
      %68 = arith.mulf %64, %67 : vector<1x256xf32>
      %c0_35 = arith.constant 0 : index
      %c0_36 = arith.constant 0 : index
      %c0_37 = arith.constant 0 : index
      %69 = vector.load %arg7[%c0_35, %c0_36, %c0_37] : memref<1x1x256xf32, #tpu.memory_space<vmem>>, vector<1x1x256xf32>
      %70 = vector.shape_cast %69 : vector<1x1x256xf32> to vector<1x256xf32>
      %71 = vector.shape_cast %68 : vector<1x256xf32> to vector<1x1x256xf32>
      tpu.vector_store %arg7[%c0_35, %c0_36, %c0_37], %71 {strides = array<i32>} : memref<1x1x256xf32, #tpu.memory_space<vmem>>, vector<1x1x256xf32>,
    } else {
    }
    return
  }
  func.func @transform_0(%arg0: i32, %arg1: i32, %arg2: memref<1xi32, #tpu.memory_space<smem>>) -> (i32, i32, i32) {
    %c0_i32 = arith.constant 0 : i32
    %c0_i32_0 = arith.constant 0 : i32
    return %arg0, %arg1, %c0_i32 : i32, i32, i32
  }
  func.func @transform_1(%arg0: i32, %arg1: i32, %arg2: memref<1xi32, #tpu.memory_space<smem>>) -> (i32, i32) {
    %c0_i32 = arith.constant 0 : i32
    %c0_i32_0 = arith.constant 0 : i32
    %c0_i32_1 = arith.constant 0 : i32
    return %c0_i32, %c0_i32_0 : i32, i32
  }
  func.func @transform_2(%arg0: i32, %arg1: i32, %arg2: memref<1xi32, #tpu.memory_space<smem>>) -> (i32, i32) {
    %c0_i32 = arith.constant 0 : i32
    %c0_i32_0 = arith.constant 0 : i32
    %c0_i32_1 = arith.constant 0 : i32
    return %c0_i32, %c0_i32_0 : i32, i32
  }
  func.func @transform_3(%arg0: i32, %arg1: i32, %arg2: memref<1xi32, #tpu.memory_space<smem>>) -> (i32, i32) {
    %c0_i32 = arith.constant 0 : i32
    %c0_i32_0 = arith.constant 0 : i32
    %c0_i32_1 = arith.constant 0 : i32
    return %c0_i32, %c0_i32_0 : i32, i32
  }
  func.func @transform_4(%arg0: i32, %arg1: i32, %arg2: memref<1xi32, #tpu.memory_space<smem>>) -> (i32, i32, i32) {
    %c0_i32 = arith.constant 0 : i32
    %c0_i32_0 = arith.constant 0 : i32
    %c0_i32_1 = arith.constant 0 : i32
    return %arg0, %c0_i32, %c0_i32_0 : i32, i32, i32
  }
}

</mosaic_0001>

<bundles_post_ra>
// kernel: tpu_custom_call.1
= control target key start
LH: loop header
LB: loop body
LE: loop exit
PB: predicated region body
PF: predicated region fallthrough
CT: control target
= control target key end

     0   :  { %s2744_s0 = inlined_call_operand.<no memory space> [shape: s32[1], index: 0, kind: input, shape index: {}]   ;;  %s2745_s1 = inlined_call_operand.hbm [shape: bf16[2,512,256], index: 1, kind: input, shape index: {}]   ;;  %s2746_s2 = inlined_call_operand.hbm [shape: bf16[256,256], index: 2, kind: input, shape index: {}]   ;;  %s2747_s3 = inlined_call_operand.hbm [shape: f32[1,256], index: 3, kind: input, shape index: {}]   ;;  %s2748_s4 = inlined_call_operand.hbm [shape: f32[1,128], index: 4, kind: input, shape index: {}]   ;;  %s2749_s5 = inlined_call_operand.hbm [shape: f32[2,1,256], index: 5, kind: output, shape index: {}]  }
   0x1   :  { %2762 = sst [smem:[#allocation24_spill]] %s2746_s2 }
   0x2   :  { %2763 = sst [smem:[#allocation25_spill]] %s2747_s3 }
   0x3   :  { %2764 = sst [smem:[#allocation26_spill]] %s2748_s4 }
   0x4   :  { %2765 = sst [smem:[#allocation27_spill]] %s2749_s5 }
   0x5   :  { %10 = sst [smem:[#allocation6]] %s2744_s0 }
   0x6   :  { %11 = vsyncpa [#allocation8], 0 }
   0x7   :  { %13 = vsyncpa [#allocation8 + $0x1], 0 }
   0x8   :  { %14 = vsyncpa [#allocation11], 0 }
   0x9   :  { %15 = vsyncpa [#allocation14], 0 }
   0xa   :  { %16 = vsyncpa [#allocation9], 0 }
   0xb   :  { %18 = vsyncpa [#allocation9 + $0x1], 0  ;;  %s2135_s20 = smov 0   ;;  %s2137_s21 = smov 0  }
   0xc   :  { %s2139_s22 = smov 0   ;;  %s2141_s23 = smov 0  }
   0xd   :  { %s2143_s24 = smov 0   ;;  %s2145_s25 = smov 0  }
   0xe   :  { %s2147_s26 = smov 0   ;;  %s2149_s0 = smov 0  }
   0xf   :  { %s2151_s27 = smov 0   ;;  %s2153_s28 = smov 0  }
  0x10   :  { %s2155_s29 = smov 0  }
  0x11 LB: > { %2766 = sst [smem:[#allocation20_spill]] %s2048_s20  ;;  %s1412_s30 = sadd.s32 4294967295, %s2088_s29   ;;  %s2088_s29 = sphi %s2155_s29, %s24_s29   ;;  %s2084_s28 = sphi %s2153_s28, %s2805_s28   ;;  %s2080_s27 = sphi %s2151_s27, %s2804_s27   ;;  %s2076_s0 = sphi %s2149_s0, %s2803_s0   ;;  %s2072_s26 = sphi %s2147_s26, %s2802_s26   ;;  %s2068_s25 = sphi %s2145_s25, %s2801_s25   ;;  %s2064_s24 = sphi %s2143_s24, %s2800_s24   ;;  %s2060_s23 = sphi %s2141_s23, %s2799_s23   ;;  %s2056_s22 = sphi %s2139_s22, %s2798_s22   ;;  %s2052_s21 = sphi %s2137_s21, %s2797_s21   ;;  %s2048_s20 = sphi %s2135_s20, %s2796_s20  }
  0x12   : > { %2767 = sst [smem:[#allocation21_spill]] %s2076_s0  ;;  %s1413_s6 = sadd.s32 4294967294, %s2088_s29  }
  0x13   : > { %p58_p0 = scmp.ne.s32.totalorder %s2064_s24, %s2060_s23  ;;  %p2191_p1 = scmp.eq.s32.totalorder %s1412_s30, 0 }
  0x14   : > { %p144_p2 = scmp.ne.s32.totalorder %s2056_s22, %s2052_s21  ;;  %p145_p4 = scmp.eq.s32.totalorder %s1412_s30, 7 }
  0x15   : > { %s2768_s7 = scalar_select %p2191_p1, 1, 0 }
  0x16   : > { %p2200_p3 = por %p2191_p1, %p58_p0  ;;  %p150_p5 = scmp.ne.s32.totalorder %s2052_s21, %s2048_s20 }
  0x17   : > { %p151_p6 = scmp.eq.s32.totalorder %s1413_s6, 7  ;;  %p2206_p7 = por %p145_p4, %p144_p2 }
  0x18   : > { %s2769_s9 = scalar_select %p2200_p3, 1, 0 }
  0x19   : > { %s2770_s10 = scalar_select %p2206_p7, 1, 0 }
  0x1a   : > { %p1414_p8 = scmp.ge.s32.totalorder %s2088_s29, 1  ;;  %p2211_p9 = por %p151_p6, %p150_p5 }
  0x1b   : > { %2771 = sst [smem:[#allocation22_spill]] %s2770_s10  ;;  %p158_p10 = scmp.lt.s32.totalorder %s2088_s29, 9 }
  0x1c   : > { %s2772_s11 = scalar_select %p2211_p9, 1, 0 }
  0x1d   : > { %p2216_p11 = pnand %p1414_p8, %p158_p10  ;;  %s2090_s13 = smov [#allocation10]  }
  0x1e   : > { %2773 = sst [smem:[#allocation23_spill]] %s2772_s11  ;;  %s170_s14 = sshll.u32 %s2090_s13, 4  ;;  %s2220_s14 = int_to_ptr.vmem [resolvable:$true] %s170_s14 }
  0x1f   : > { %s2774_s12 = scalar_select %p2216_p11, 1, 0 }
  0x20   : > { %p1537_p12 = pneg %p2216_p11  ;;  %s2091_s16 = smov [#allocation12]  }
  0x21   : > { %s184_s17 = sshll.u32 %s2091_s16, 4  ;;  %s2092_s18 = smov [#allocation13]   ;;  %s2230_s17 = int_to_ptr.vmem [resolvable:$true] %s184_s17 }
  0x22   : > { %p2226_p13 = pnand %p1537_p12, %p2191_p1  ;;  %s2232_s19 = sshll.u32 %s2092_s18, 4  ;;  %s196_s19 = int_to_ptr.vmem [resolvable:$true] %s2232_s19 }
  0x23   : > { %s2776_s2 = sld [smem:[#allocation24_spill]] }
  0x24   : > { %p2242_p2 = pneg %p2226_p13 }
  0x29   : > { %s1844_s6 = scalar_lea.hbm %s2776_s2, 4096 }
  0x2a   : > { %p1845_p0 = scmp.ne.s32.totalorder %s2776_s2, %s1844_s6  ;;  %p1851_p6 = scmp.lt.u32.totalorder %s1844_s6, %s2776_s2 }
  0x2c   : > { %p1847_p4 = pnand %p2242_p2, %p1845_p0 }
  0x2e   : > { %p1848_p5 = pneg %p1847_p4 }
  0x30   : > { %p1853_p8 = pnand %p1851_p6, %p1848_p5 }
  0x32   : > { %1856 = shalt.err (!%p1853_p8)
}
  0x33   : > { %s1857_s8 = scalar_lea.vmem %s2220_s14, 4096  ;;  %p1865_p7 = scmp.lt.s32.totalorder %s2220_s14, %s2220_s14 }
  0x34   : > { %p1858_p10 = scmp.ne.s32.totalorder %s2220_s14, %s1857_s8  ;;  %p1866_p1 = scmp.lt.s32.totalorder %s1857_s8, %s1857_s8 }
  0x36   : > { %p1860_p12 = pnand %p1858_p10, %p2242_p2  ;;  %p1867_p0 = por %p1866_p1, %p1865_p7 }
  0x38   : > { %p1861_p9 = pneg %p1860_p12 }
  0x3a   : > { %p1868_p4 = pnand %p1867_p0, %p1861_p9 }
  0x3c   : > { %1871 = shalt.err (!%p1868_p4)
}
  0x3d   : > { %s2760_s23 = smov 128   ;;  %s2761_s30 = smov 8  }
  0x3e   : > { %1540 = dma.hbm_to_vmem [thread:$0]  (!%p2226_p13), %s2776_s2, 4096, %s2220_s14, [#allocation11], %s2760_s23, %s2760_s23, %s2761_s30  }
  0x3f   : > { %s2778_s3 = sld [smem:[#allocation25_spill]] }
  0x45   : > { %s1872_s8 = scalar_lea.hbm %s2778_s3, 32 }
  0x46   : > { %p1873_p1 = scmp.ne.s32.totalorder %s2778_s3, %s1872_s8  ;;  %p1879_p5 = scmp.lt.u32.totalorder %s1872_s8, %s2778_s3 }
  0x48   : > { %p1875_p7 = pnand %p1873_p1, %p2242_p2 }
  0x4a   : > { %p1876_p9 = pneg %p1875_p7 }
  0x4c   : > { %p1881_p6 = pnand %p1879_p5, %p1876_p9 }
  0x4e   : > { %1884 = shalt.err (!%p1881_p6)
}
  0x4f   : > { %s1885_s14 = scalar_lea.vmem %s2230_s17, 32  ;;  %p1893_p0 = scmp.lt.s32.totalorder %s2230_s17, %s2230_s17 }
  0x50   : > { %p1886_p8 = scmp.ne.s32.totalorder %s2230_s17, %s1885_s14  ;;  %p1894_p4 = scmp.lt.s32.totalorder %s1885_s14, %s1885_s14 }
  0x52   : > { %p1888_p10 = pnand %p1886_p8, %p2242_p2  ;;  %p1895_p1 = por %p1894_p4, %p1893_p0 }
  0x54   : > { %p1889_p12 = pneg %p1888_p10 }
  0x56   : > { %p1896_p7 = pnand %p1895_p1, %p1889_p12 }
  0x58   : > { %1899 = shalt.err (!%p1896_p7)
}
  0x59   : > { %1543 = dma.hbm_to_vmem [thread:$0]  (!%p2226_p13), %s2778_s3, 32, %s2230_s17, [#allocation11]  }
  0x5a   : > { %s2779_s4 = sld [smem:[#allocation26_spill]] }
  0x60   : > { %s1900_s6 = scalar_lea.hbm %s2779_s4, 16 }
  0x61   : > { %p1901_p9 = scmp.ne.s32.totalorder %s2779_s4, %s1900_s6  ;;  %p1907_p8 = scmp.lt.u32.totalorder %s1900_s6, %s2779_s4 }
  0x63   : > { %p1903_p5 = pnand %p1901_p9, %p2242_p2 }
  0x65   : > { %p1904_p6 = pneg %p1903_p5 }
  0x67   : > { %p1909_p10 = pnand %p1907_p8, %p1904_p6 }
  0x69   : > { %1912 = shalt.err (!%p1909_p10)
}
  0x6a   : > { %s1913_s14 = scalar_lea.vmem %s196_s19, 16  ;;  %s1920_s17 = scalar_lea.vmem %s196_s19, 32 }
  0x6b   : > { %p1914_p12 = scmp.ne.s32.totalorder %s196_s19, %s1913_s14  ;;  %p1921_p1 = scmp.lt.s32.totalorder %s196_s19, %s196_s19 }
  0x6c   : > { %p1922_p7 = scmp.lt.s32.totalorder %s1920_s17, %s1913_s14 }
  0x6d   : > { %p1916_p0 = pnand %p1914_p12, %p2242_p2 }
  0x6e   : > { %p1923_p3 = por %p1922_p7, %p1921_p1 }
  0x6f   : > { %p1917_p4 = pneg %p1916_p0 }
  0x71   : > { %p1924_p11 = pnand %p1923_p3, %p1917_p4 }
  0x73   : > { %1927 = shalt.err (!%p1924_p11)
}
  0x74   : > { %1546 = dma.hbm_to_vmem [thread:$0]  (!%p2226_p13), %s2779_s4, 16, %s196_s19, [#allocation14]  }
  0x75   : > { %s33_s11 = sadd.s32 1, %s2080_s27  ;;  %s36_s0 = sadd.s32 1, %s2084_s28 }
  0x76   : > { %p34_p3 = scmp.ge.s32.totalorder %s33_s11, 4  ;;  %s45_s10 = sadd.s32 1, %s2068_s25 }
  0x77   : > { %p52_p11 = scmp.ne.s32.totalorder %s2068_s25, %s2064_s24  ;;  %p53_p2 = scmp.eq.s32.totalorder %s2088_s29, 0 }
  0x78   : > { %s2807_s11 = smov (%p34_p3, %s33_s11), 0  ;;  %s2809_s0 = smov (!%p34_p3, %s36_s0), %s2084_s28 }
  0x79   : > { %s41_s15 = ssub.s32 %s2080_s27, %s2807_s11  ;;  %p38_p9 = scmp.ge.s32.totalorder %s2809_s0, 2 }
  0x7a   : > { %p1558_p5 = scmp.lt.s32.totalorder %s2088_s29, 8  ;;  %p2320_p13 = por %p53_p2, %p52_p11 }
  0x7b   : > { %s206_s6 = sand.u32 1, %s2068_s25   ;;  %s2811_s0 = smov (%p38_p9, %s2809_s0), 0 }
  0x7c   : > { %s1419_s13 = sshll.u32 %s206_s6, 7  ;;  %s40_s16 = ssub.s32 %s2084_s28, %s2811_s0 }
  0x7d   : > { %s42_s18 = sor.u32 %s41_s15, %s40_s16  ;;  %p132_p6 = scmp.eq.s32.totalorder %s40_s16, 0 }
  0x7e   : > { %p43_p8 = scmp.eq.s32.totalorder %s42_s18, 0  ;;  %s1487_s8 = sshll.u32 %s2080_s27, 5 }
  0x7f   : > { %s2781_s14 = sadd.s32 1, %s2056_s22  ;;  %s1422_s20 = sshll.u32 %s2084_s28, 7 }
  0x80   : > { %s2333_s17 = scalar_select %p132_p6, %s2056_s22, %s2781_s14  }
  0x81   : > { %s2336_s5 = scalar_select %p43_p8, %s2068_s25, %s45_s10  }
  0x82   : > { %s210_s23 = scalar_lea.vmem [#allocation7], %s1419_s13  ;;  %s217_s2 = sadd.s32 %s1487_s8, %s1422_s20 }
  0x83   : > { %s220_s30 = sshll.u32 %s210_s23, 4  ;;  %s1423_s3 = sshll.u32 %s217_s2, 6  ;;  %s2339_s30 = int_to_ptr.vmem [resolvable:$true] %s220_s30 }
  0x84   : > { %p2345_p10 = pnand %p1558_p5, %p2320_p13  ;;  %s2352_s10 = scalar_lea.hbm %s2745_s1, %s1423_s3 }
  0x85   : > { %s2354_s23 = scalar_lea.sflag [#allocation8], %s206_s6  ;;  %s1928_s2 = scalar_lea.hbm %s2352_s10, 2048 }
  0x86   : > { %p1929_p12 = scmp.ne.s32.totalorder %s2352_s10, %s1928_s2  ;;  %p1930_p0 = pneg %p2345_p10 }
  0x87   : > { %s1933_s18 = scalar_lea.hbm %s2745_s1, 16384  ;;  %p1934_p7 = scmp.lt.u32.totalorder %s2352_s10, %s2745_s1 }
  0x88   : > { %p1931_p4 = pnand %p1930_p0, %p1929_p12  ;;  %p1935_p3 = scmp.lt.u32.totalorder %s1933_s18, %s1928_s2 }
  0x89   : > { %p1937_p2 = scmp.lt.u32.totalorder %s1928_s2, %s2352_s10 }
  0x8a   : > { %p1932_p1 = pneg %p1931_p4  ;;  %p1936_p11 = por %p1935_p3, %p1934_p7 }
  0x8c   : > { %p1938_p9 = por %p1937_p2, %p1936_p11 }
  0x8e   : > { %p1939_p5 = pnand %p1938_p9, %p1932_p1 }
  0x90   : > { %1942 = shalt.err (!%p1939_p5)
}
  0x91   : > { %s1943_s6 = scalar_lea.vmem %s2339_s30, 2048  ;;  %s2095_s14 = smov [#allocation7]  }
  0x92   : > { %p1944_p13 = scmp.ne.s32.totalorder %s2339_s30, %s1943_s6  ;;  %s1948_s20 = sshll.u32 %s2095_s14, 4  ;;  %s1949_s20 = int_to_ptr.vmem [resolvable:$false] %s1948_s20 }
  0x93   : > { %s1950_s15 = scalar_lea.vmem %s1949_s20, 4096  ;;  %p1951_p12 = scmp.lt.s32.totalorder %s2339_s30, %s1949_s20 }
  0x94   : > { %p1946_p6 = pnand %p1944_p13, %p1930_p0  ;;  %p1952_p4 = scmp.lt.s32.totalorder %s1950_s15, %s1943_s6 }
  0x96   : > { %p1947_p8 = pneg %p1946_p6  ;;  %p1953_p7 = por %p1952_p4, %p1951_p12 }
  0x98   : > { %p1954_p3 = pnand %p1953_p7, %p1947_p8 }
  0x9a   : > { %1957 = shalt.err (!%p1954_p3)
}
  0x9b   : > { %s2783_s16 = smov 8   ;;  %s2784_s2 = smov 128  }
  0x9c   : > { %1550 = dma.hbm_to_vmem [thread:$0]  (!%p2345_p10), %s2352_s10, 2048, %s2339_s30, %s2354_s23, %s2784_s2, %s2784_s2, %s2783_s16  }
  0x9d   : > { %p2785_p0 = scmp.ne.s32.totalorder %s2774_s12, 0 }
  0x9e   : > { %s234_s19 = sand.u32 (!%p2785_p0), 1, %s2064_s24   ;;  %p2786_p1 = scmp.ne.s32.totalorder (!%p2785_p0), %s2769_s9, 0 }
  0x9f   : > { %232 = sbr.rel (%p2785_p0) target bundleno = 1032 (0x408), region = 36  ;;  %s1425_s13 = sshll.u32 (!%p2785_p0), %s234_s19, 7 }
  0xa0   : > { %s235_s18 = scalar_lea.sflag (!%p2785_p0), [#allocation8], %s234_s19  ;;  %s2388_s3 = scalar_lea.vmem (!%p2785_p0), [#allocation7], %s1425_s13 }
  0xa6   : > { %2031 = dma.done.wait (%p2786_p1), %s235_s18, 2048  }
  0xa7   : > { %2033 = vsyncadd (%p2786_p1), %s235_s18, 4294965248  ;;  %p2787_p11 = scmp.ne.s32.totalorder %s2768_s7, 0 }
  0xa9   : > { %2035 = dma.done.wait (%p2787_p11), [#allocation11], 4128  }
  0xaa   : > { %2037 = vsyncadd (%p2787_p11), [#allocation11], 4294963168 }
  0xab   : > { %2039 = dma.done.wait (%p2787_p11), [#allocation14], 16  }
  0xac   : > { %2041 = vsyncadd (%p2787_p11), [#allocation14], 4294967280  ;;  %s272_s4 = sand.u32 1, %s2052_s21   ;;  %p1430_p10 = scmp.ne.s32.totalorder %s2072_s26, 0 }
  0xad   : > { %s2405_s12 = sshll.u32 %s272_s4, 1  ;;  %vm280_vm0 = vcmask (!%p1430_p10), 0   ;;  %v283_v0 = vlaneseq (!%p1430_p10)  ;;  %v2096_v1 = vmov (!%p1430_p10), -inf   ;;  %v2097_v2 = vmov (!%p1430_p10), 0.0  }
  0xae   : > { %s274_s9 = scalar_lea.vmem [#allocation15], %s2405_s12  ;;  %279 = sbr.rel (%p1430_p10) target bundleno = 181 (0xb5), region = 56  ;;  %281 = vst.msk [vmem:[#allocation2] sm:$0x1] (!%p1430_p10), %vm280_vm0, %v2096_v1  ;;  %282 = vst.msk [vmem:[#allocation3] sm:$0x1] (!%p1430_p10), %vm280_vm0, %v2097_v2 }
  0xaf   : > { %vm285_vm1 = vcmp.lt.s32.totalorder (!%p1430_p10), %v283_v0, 256 }
  0xb0   : > { %287 = vst.msk [vmem:[#allocation4] sm:$0x3] (!%p1430_p10), %vm285_vm1, %v2097_v2 }
  0xb5 PF: > { %v1663_v3 = vld [vmem:[#allocation10 + $0x4] ss:$8 sps:$4 sm:$0xff]   ;;  %v1665_v4 = vld [vmem:[#allocation10] ss:$8 sps:$4 sm:$0xff]   ;;  %v1666_v5 = vld [vmem:[#allocation10 + $0x14] ss:$8 sps:$4 sm:$0xff]  }
  0xb6   : > { %588 = vmatprep.subr.bf16.mxu0 %v1663_v3  ;;  %1489 = vmatprep.subr.bf16.mxu1 %v1663_v3  ;;  %v1668_v6 = vld [vmem:[#allocation10 + $0x10] ss:$8 sps:$4 sm:$0xff]   ;;  %v1669_v7 = vld [vmem:[#allocation10 + $0x24] ss:$8 sps:$4 sm:$0xff]   ;;  %v1671_v8 = vld [vmem:[#allocation10 + $0x20] ss:$8 sps:$4 sm:$0xff]   ;;  %v338_v3 = vlaneseq }
  0xb7   : > { %589 = vmatpush1.bf16.msra.mxu0 %v1665_v4  ;;  %1505 = vmatpush1.bf16.msra.mxu1 %v1665_v4  ;;  %v1672_v9 = vld [vmem:[#allocation10 + $0x34] ss:$8 sps:$4 sm:$0xff]   ;;  %v1674_v10 = vld [vmem:[#allocation10 + $0x30] ss:$8 sps:$4 sm:$0xff]   ;;  %v1675_v11 = vld [vmem:[#allocation10 + $0x44] ss:$8 sps:$4 sm:$0xff]  }
  0xb8   : > { %590 = vmatprep.subr.bf16.mxu0 %v1666_v5  ;;  %1490 = vmatprep.subr.bf16.mxu1 %v1666_v5  ;;  %v1677_v12 = vld [vmem:[#allocation10 + $0x40] ss:$8 sps:$4 sm:$0xff]   ;;  %v1678_v13 = vld [vmem:[#allocation10 + $0x54] ss:$8 sps:$4 sm:$0xff]   ;;  %v1680_v14 = vld [vmem:[#allocation10 + $0x50] ss:$8 sps:$4 sm:$0xff]  }
  0xb9   : > { %v1681_v15 = vld [vmem:[#allocation10 + $0x64] ss:$8 sps:$4 sm:$0xff]   ;;  %v1683_v21 = vld [vmem:[#allocation10 + $0x60] ss:$8 sps:$4 sm:$0xff]   ;;  %v1684_v23 = vld [vmem:[#allocation10 + $0x74] ss:$8 sps:$4 sm:$0xff]  }
  0xba   : > { %v2410_v16 = vld [vmem:[%s2388_s3] sm:$0xff]  ;;  %v2413_v17 = vld [vmem:[%s2388_s3 + $0x8] sm:$0xff]  ;;  %v1686_v24 = vld [vmem:[#allocation10 + $0x70] ss:$8 sps:$4 sm:$0xff]   ;;  %v2442_v4 = vshrl.u32 %v338_v3, 7  ;;  %s887_s7 = sld [smem:[#allocation6]] }
  0xbb   : > { %591 = vmatpush1.bf16.msra.mxu0 %v1668_v6  ;;  %1506 = vmatpush1.bf16.msra.mxu1 %v1668_v6  ;;  %v1432_v18 = vcombine.high %v2410_v16, %v2413_v17  ;;  %v2418_v19 = vld [vmem:[%s2388_s3 + $0x40] sm:$0xff]  ;;  %v2421_v20 = vld [vmem:[%s2388_s3 + $0x48] sm:$0xff]  ;;  %v1690_v27 = vld [vmem:[#allocation10 + $0x94] ss:$8 sps:$4 sm:$0xff]   ;;  %v1431_v45 = vcombine.low %v2410_v16, %v2413_v17  ;;  %s1480_s30 = sshll.u32 %s2072_s26, 7  ;;  %p1481_p2 = scmp.ne.s32.totalorder %s2072_s26, 3 }
  0xbc   : > { %592 = vmatprep.subr.bf16.mxu0 %v1669_v7  ;;  %1491 = vmatprep.subr.bf16.mxu1 %v1669_v7  ;;  %v1440_v22 = vcombine.high %v2418_v19, %v2421_v20  ;;  %v1687_v25 = vld [vmem:[#allocation10 + $0x84] ss:$8 sps:$4 sm:$0xff]   ;;  %v1689_v26 = vld [vmem:[#allocation10 + $0x80] ss:$8 sps:$4 sm:$0xff]   ;;  %v1692_v28 = vld [vmem:[#allocation10 + $0x90] ss:$8 sps:$4 sm:$0xff]   ;;  %v1439_v46 = vcombine.low %v2418_v19, %v2421_v20 }
  0xbd   : > { %620 = vmatprep.mubr.bf16.mxu0 %v1432_v18  ;;  %v1693_v29 = vld [vmem:[#allocation10 + $0xa4] ss:$8 sps:$4 sm:$0xff]   ;;  %v1695_v30 = vld [vmem:[#allocation10 + $0xa0] ss:$8 sps:$4 sm:$0xff]   ;;  %v1696_v31 = vld [vmem:[#allocation10 + $0xb4] ss:$8 sps:$4 sm:$0xff]  }
  0xbe   : > { %660 = vmatprep.mubr.bf16.mxu1 %v1440_v22  ;;  %v1698_v32 = vld [vmem:[#allocation10 + $0xb0] ss:$8 sps:$4 sm:$0xff]   ;;  %v1699_v33 = vld [vmem:[#allocation10 + $0xc4] ss:$8 sps:$4 sm:$0xff]   ;;  %v1701_v34 = vld [vmem:[#allocation10 + $0xc0] ss:$8 sps:$4 sm:$0xff]  }
  0xbf   : > { %593 = vmatpush1.bf16.msra.mxu0 %v1671_v8  ;;  %1507 = vmatpush1.bf16.msra.mxu1 %v1671_v8  ;;  %v1702_v35 = vld [vmem:[#allocation10 + $0xd4] ss:$8 sps:$4 sm:$0xff]   ;;  %v1704_v36 = vld [vmem:[#allocation10 + $0xd0] ss:$8 sps:$4 sm:$0xff]   ;;  %v1705_v37 = vld [vmem:[#allocation10 + $0xe4] ss:$8 sps:$4 sm:$0xff]  }
  0xc0   : > { %594 = vmatprep.subr.bf16.mxu0 %v1672_v9  ;;  %1492 = vmatprep.subr.bf16.mxu1 %v1672_v9  ;;  %v1707_v38 = vld [vmem:[#allocation10 + $0xe0] ss:$8 sps:$4 sm:$0xff]   ;;  %v1708_v39 = vld [vmem:[#allocation10 + $0xf4] ss:$8 sps:$4 sm:$0xff]   ;;  %v1710_v40 = vld [vmem:[#allocation10 + $0xf0] ss:$8 sps:$4 sm:$0xff]  }
  0xc1   : > { %v290_v41 = vld [vmem:[%s2388_s3 + $0x10] sm:$0xff]  ;;  %v291_v42 = vld [vmem:[%s2388_s3 + $0x18] sm:$0xff]  ;;  %v292_v49 = vld [vmem:[%s2388_s3 + $0x20] sm:$0xff]  ;;  %v2445_v5 = vsub.s32 0, %v2442_v4  ;;  %v344_v7 = vsub.s32 1, %v2442_v4 }
  0xc2   : > { %v298_v43 = vld [vmem:[%s2388_s3 + $0x50] sm:$0xff]  ;;  %v299_v44 = vld [vmem:[%s2388_s3 + $0x58] sm:$0xff]  ;;  %v1434_v47 = vcombine.high %v290_v41, %v291_v42  ;;  %v293_v50 = vld [vmem:[%s2388_s3 + $0x28] sm:$0xff]  ;;  %v1433_v53 = vcombine.low %v290_v41, %v291_v42 }
  0xc3   : > { %595 = vmatpush1.bf16.msra.mxu0 %v1674_v10  ;;  %1508 = vmatpush1.bf16.msra.mxu1 %v1674_v10  ;;  %v1442_v48 = vcombine.high %v298_v43, %v299_v44  ;;  %v300_v51 = vld [vmem:[%s2388_s3 + $0x60] sm:$0xff]  ;;  %v301_v52 = vld [vmem:[%s2388_s3 + $0x68] sm:$0xff]  ;;  %v1441_v54 = vcombine.low %v298_v43, %v299_v44  ;;  %v1436_v55 = vcombine.high %v292_v49, %v293_v50  ;;  %v294_v57 = vld [vmem:[%s2388_s3 + $0x30] sm:$0xff] }
  0xc4   : > { %596 = vmatprep.subr.bf16.mxu0 %v1675_v11  ;;  %1493 = vmatprep.subr.bf16.mxu1 %v1675_v11  ;;  %v1444_v56 = vcombine.high %v300_v51, %v301_v52  ;;  %v295_v58 = vld [vmem:[%s2388_s3 + $0x38] sm:$0xff]  ;;  %v302_v59 = vld [vmem:[%s2388_s3 + $0x70] sm:$0xff]  ;;  %v1435_v61 = vcombine.low %v292_v49, %v293_v50  ;;  %v1443_v62 = vcombine.low %v300_v51, %v301_v52  ;;  %v336_v6 = vld [vmem:[#allocation12] sm:$0x3] }
  0xc5   : > { %v303_v60 = vld [vmem:[%s2388_s3 + $0x78] sm:$0xff]  ;;  %v1438_v63 = vcombine.high %v294_v57, %v295_v58  ;;  %v1437_v1 = vcombine.low %v294_v57, %v295_v58  ;;  %v2449_v8 = vrot.slane %v336_v6, %v2445_v5  ;;  %v2451_v9 = vrot.slane %v336_v6, %v344_v7 }
  0xc6   : > { %v1446_v0 = vcombine.high %v302_v59, %v303_v60  ;;  %v1445_v2 = vcombine.low %v302_v59, %v303_v60 }
  0xc7   : > { %597 = vmatpush1.bf16.msra.mxu0 %v1677_v12  ;;  %1509 = vmatpush1.bf16.msra.mxu1 %v1677_v12 }
  0xc8   : > { %598 = vmatprep.subr.bf16.mxu0 %v1678_v13  ;;  %1494 = vmatprep.subr.bf16.mxu1 %v1678_v13 }
  0xcb   : > { %599 = vmatpush1.bf16.msra.mxu0 %v1680_v14  ;;  %1510 = vmatpush1.bf16.msra.mxu1 %v1680_v14 }
  0xcc   : > { %600 = vmatprep.subr.bf16.mxu0 %v1681_v15  ;;  %1495 = vmatprep.subr.bf16.mxu1 %v1681_v15 }
  0xcf   : > { %601 = vmatpush1.bf16.msra.mxu0 %v1683_v21  ;;  %1511 = vmatpush1.bf16.msra.mxu1 %v1683_v21 }
  0xd0   : > { %602 = vmatprep.subr.bf16.mxu0 %v1684_v23  ;;  %1496 = vmatprep.subr.bf16.mxu1 %v1684_v23 }
  0xd3   : > { %603 = vmatpush1.bf16.msra.mxu0 %v1686_v24  ;;  %1512 = vmatpush1.bf16.msra.mxu1 %v1686_v24 }
  0xd4   : > { %604 = vmatprep.subr.bf16.mxu0 %v1687_v25  ;;  %1497 = vmatprep.subr.bf16.mxu1 %v1687_v25 }
  0xd7   : > { %605 = vmatpush1.bf16.msra.mxu0 %v1689_v26  ;;  %1513 = vmatpush1.bf16.msra.mxu1 %v1689_v26 }
  0xd8   : > { %606 = vmatprep.subr.bf16.mxu0 %v1690_v27  ;;  %1498 = vmatprep.subr.bf16.mxu1 %v1690_v27 }
  0xdb   : > { %607 = vmatpush1.bf16.msra.mxu0 %v1692_v28  ;;  %1514 = vmatpush1.bf16.msra.mxu1 %v1692_v28 }
  0xdc   : > { %608 = vmatprep.subr.bf16.mxu0 %v1693_v29  ;;  %1499 = vmatprep.subr.bf16.mxu1 %v1693_v29 }
  0xdf   : > { %609 = vmatpush1.bf16.msra.mxu0 %v1695_v30  ;;  %1515 = vmatpush1.bf16.msra.mxu1 %v1695_v30 }
  0xe0   : > { %610 = vmatprep.subr.bf16.mxu0 %v1696_v31  ;;  %1500 = vmatprep.subr.bf16.mxu1 %v1696_v31 }
  0xe3   : > { %611 = vmatpush1.bf16.msra.mxu0 %v1698_v32  ;;  %1516 = vmatpush1.bf16.msra.mxu1 %v1698_v32 }
  0xe4   : > { %612 = vmatprep.subr.bf16.mxu0 %v1699_v33  ;;  %1501 = vmatprep.subr.bf16.mxu1 %v1699_v33 }
  0xe7   : > { %613 = vmatpush1.bf16.msra.mxu0 %v1701_v34  ;;  %1517 = vmatpush1.bf16.msra.mxu1 %v1701_v34 }
  0xe8   : > { %614 = vmatprep.subr.bf16.mxu0 %v1702_v35  ;;  %1502 = vmatprep.subr.bf16.mxu1 %v1702_v35 }
  0xeb   : > { %615 = vmatpush1.bf16.msra.mxu0 %v1704_v36  ;;  %1518 = vmatpush1.bf16.msra.mxu1 %v1704_v36 }
  0xec   : > { %616 = vmatprep.subr.bf16.mxu0 %v1705_v37  ;;  %1503 = vmatprep.subr.bf16.mxu1 %v1705_v37 }
  0xef   : > { %617 = vmatpush1.bf16.msra.mxu0 %v1707_v38  ;;  %1519 = vmatpush1.bf16.msra.mxu1 %v1707_v38 }
  0xf0   : > { %618 = vmatprep.subr.bf16.mxu0 %v1708_v39  ;;  %1504 = vmatprep.subr.bf16.mxu1 %v1708_v39 }
  0xf3   : > { %619 = vmatpush1.bf16.msra.mxu0 %v1710_v40  ;;  %1520 = vmatpush1.bf16.msra.mxu1 %v1710_v40 }
  0xf6   : > { %621 = vmatmul.mubr.bf16.vlgmr.msra.gmra.mrb[0].mxu0 %v1431_v45  ;;  %661 = vmatmul.mubr.bf16.vlgmr.msra.gmra.mrb[0].mxu1 %v1439_v46 }
  0xf7   : > { %630 = vmatprep.mubr.bf16.mxu0 %v1434_v47  ;;  %670 = vmatprep.mubr.bf16.mxu1 %v1442_v48 }
  0xfe   : > { %631 = vmatmul.mubr.bf16.gmra.mrb[4].mxu0 %v1433_v53  ;;  %671 = vmatmul.mubr.bf16.gmra.mrb[4].mxu1 %v1441_v54 }
  0xff   : > { %640 = vmatprep.mubr.bf16.mxu0 %v1436_v55  ;;  %680 = vmatprep.mubr.bf16.mxu1 %v1444_v56 }
 0x106   : > { %641 = vmatmul.mubr.bf16.gmra.mrb[8].mxu0 %v1435_v61  ;;  %681 = vmatmul.mubr.bf16.gmra.mrb[8].mxu1 %v1443_v62 }
 0x107   : > { %650 = vmatprep.mubr.bf16.mxu0 %v1438_v63  ;;  %690 = vmatprep.mubr.bf16.mxu1 %v1446_v0 }
 0x10e   : > { %651 = vmatmul.mubr.bf16.gmra.mrb[12].mxu0 %v1437_v1  ;;  %691 = vmatmul.mubr.bf16.gmra.mrb[12].mxu1 %v1445_v2 }
 0x1c9   : > { %v622_v10 = vpop.f32.mrb[0].mxu0  ;;  %v662_v11 = vpop.f32.mrb[0].mxu1 }
 0x1ca   : > { %v623_v12 = vadd.f32 %v622_v10, %v2449_v8  ;;  %v663_v13 = vadd.f32 %v662_v11, %v2449_v8  ;;  %v624_v14 = vpop.f32.mrb[1].mxu0  ;;  %v664_v15 = vpop.f32.mrb[1].mxu1 }
 0x1cb   : > { %v625_v16 = vadd.f32 %v624_v14, %v2451_v9  ;;  %v665_v17 = vadd.f32 %v664_v15, %v2451_v9  ;;  %v626_v18 = vpop.f32.mrb[2].mxu0  ;;  %v666_v19 = vpop.f32.mrb[2].mxu1 }
 0x1cc   : > { %1727 = vtanh.f32 %v623_v12  ;;  %v627_v20 = vadd.f32 %v626_v18, %v2449_v8  ;;  %v667_v21 = vadd.f32 %v666_v19, %v2449_v8  ;;  %v628_v22 = vpop.f32.mrb[3].mxu0  ;;  %v668_v23 = vpop.f32.mrb[3].mxu1 }
 0x1cd   : > { %1729 = vtanh.f32 %v663_v13  ;;  %v717_v24 = vmul.f32 0.5, %v625_v16  ;;  %v725_v25 = vmul.f32 0.5, %v665_v17  ;;  %v629_v26 = vadd.f32 %v628_v22, %v2451_v9  ;;  %v2479_v22 = vld [vmem:[#allocation13] ss:$0 sm:$0xff] }
 0x1ce   : > { %1731 = vtanh.f32 %v627_v20  ;;  %v669_v27 = vadd.f32 %v668_v23, %v2451_v9 }
 0x1cf   : > { %1733 = vtanh.f32 %v717_v24  ;;  %v718_v28 = vmul.f32 0.5, %v629_v26 }
 0x1d0   : > { %1735 = vtanh.f32 %v725_v25  ;;  %v726_v29 = vmul.f32 0.5, %v669_v27 }
 0x1d1   : > { %1737 = vtanh.f32 %v667_v21  ;;  %v632_v30 = vpop.f32.mrb[4].mxu0  ;;  %v672_v31 = vpop.f32.mrb[4].mxu1 }
 0x1d2   : > { %1739 = vtanh.f32 %v718_v28  ;;  %v633_v32 = vadd.f32 %v632_v30, %v2449_v8  ;;  %v673_v33 = vadd.f32 %v672_v31, %v2449_v8  ;;  %v634_v34 = vpop.f32.mrb[5].mxu0  ;;  %v674_v35 = vpop.f32.mrb[5].mxu1 }
 0x1d3   : > { %1741 = vtanh.f32 %v726_v29  ;;  %v635_v36 = vadd.f32 %v634_v34, %v2451_v9  ;;  %v675_v37 = vadd.f32 %v674_v35, %v2451_v9  ;;  %v636_v38 = vpop.f32.mrb[6].mxu0  ;;  %v676_v39 = vpop.f32.mrb[6].mxu1 }
 0x1d4   : > { %1743 = vtanh.f32 %v633_v32  ;;  %v637_v40 = vadd.f32 %v636_v38, %v2449_v8  ;;  %v677_v41 = vadd.f32 %v676_v39, %v2449_v8  ;;  %v638_v42 = vpop.f32.mrb[7].mxu0  ;;  %v678_v43 = vpop.f32.mrb[7].mxu1 }
 0x1d5   : > { %1745 = vtanh.f32 %v673_v33  ;;  %v719_v44 = vmul.f32 0.5, %v635_v36  ;;  %v727_v45 = vmul.f32 0.5, %v675_v37  ;;  %v639_v46 = vadd.f32 %v638_v42, %v2451_v9 }
 0x1d6   : > { %v1728_v47 = vpop.eup %1727  ;;  %1747 = vtanh.f32 %v637_v40  ;;  %v679_v48 = vadd.f32 %v678_v43, %v2451_v9 }
 0x1d7   : > { %v1730_v49 = vpop.eup %1729  ;;  %1749 = vtanh.f32 %v719_v44  ;;  %v720_v50 = vmul.f32 0.5, %v639_v46 }
 0x1d8   : > { %v1732_v51 = vpop.eup %1731  ;;  %1751 = vtanh.f32 %v727_v45  ;;  %v728_v52 = vmul.f32 0.5, %v679_v48 }
 0x1d9   : > { %v1734_v53 = vpop.eup %1733  ;;  %1753 = vtanh.f32 %v677_v41  ;;  %v642_v54 = vpop.f32.mrb[8].mxu0 }
 0x1da   : > { %v682_v55 = vpop.f32.mrb[8].mxu1  ;;  %v1736_v56 = vpop.eup %1735  ;;  %v749_v57 = vadd.f32 1.0, %v1734_v53  ;;  %1755 = vtanh.f32 %v720_v50  ;;  %v643_v58 = vadd.f32 %v642_v54, %v2449_v8 }
 0x1db   : > { %v683_v59 = vadd.f32 %v682_v55, %v2449_v8  ;;  %v644_v60 = vpop.f32.mrb[9].mxu0  ;;  %v684_v61 = vpop.f32.mrb[9].mxu1  ;;  %v757_v63 = vadd.f32 1.0, %v1736_v56  ;;  %1757 = vtanh.f32 %v728_v52 }
 0x1dc   : > { %v2471_v62 = vpop.eup %1737  ;;  %v645_v0 = vadd.f32 %v644_v60, %v2451_v9  ;;  %v685_v1 = vadd.f32 %v684_v61, %v2451_v9  ;;  %v646_v2 = vpop.f32.mrb[10].mxu0  ;;  %1759 = vtanh.f32 %v643_v58  ;;  %v765_v12 = vmul.f32 0.5, %v749_v57 }
 0x1dd   : > { %v686_v6 = vpop.f32.mrb[10].mxu1  ;;  %v1740_v7 = vpop.eup %1739  ;;  %v773_v14 = vmul.f32 0.5, %v757_v63  ;;  %v647_v17 = vadd.f32 %v646_v2, %v2449_v8  ;;  %1761 = vtanh.f32 %v683_v59 }
 0x1de   : > { %v648_v10 = vpop.f32.mrb[11].mxu0  ;;  %v688_v11 = vpop.f32.mrb[11].mxu1  ;;  %v750_v15 = vadd.f32 1.0, %v1740_v7  ;;  %v721_v16 = vmul.f32 0.5, %v645_v0  ;;  %v729_v20 = vmul.f32 0.5, %v685_v1  ;;  %v781_v26 = vmul.f32 %v1728_v47, %v765_v12 }
 0x1df   : > { %v1742_v13 = vpop.eup %1741  ;;  %v649_v21 = vadd.f32 %v648_v10, %v2451_v9  ;;  %v689_v25 = vadd.f32 %v688_v11, %v2451_v9  ;;  %v687_v28 = vadd.f32 %v686_v6, %v2449_v8  ;;  %v789_v30 = vmul.f32 %v1730_v49, %v773_v14 }
 0x1e0   : > { %v2476_v18 = vpop.eup %1743  ;;  %v758_v19 = vadd.f32 1.0, %v1742_v13  ;;  %v766_v24 = vmul.f32 0.5, %v750_v15  ;;  %1763 = vtanh.f32 %v721_v16  ;;  %v804_v35 = vmul.f32 %v2479_v22, %v781_v26 }
 0x1e1   : > { %v2481_v23 = vpop.eup %1745  ;;  %1765 = vtanh.f32 %v729_v20  ;;  %v722_v29 = vmul.f32 0.5, %v649_v21  ;;  %v730_v32 = vmul.f32 0.5, %v689_v25  ;;  %v652_v33 = vpop.f32.mrb[12].mxu0  ;;  %v812_v11 = vmul.f32 %v2479_v22, %v789_v30 }
 0x1e2   : > { %v1748_v27 = vpop.eup %1747  ;;  %1767 = vtanh.f32 %v647_v17  ;;  %v692_v34 = vpop.f32.mrb[12].mxu1  ;;  %v782_v36 = vmul.f32 %v1732_v51, %v766_v24  ;;  %v653_v39 = vadd.f32 %v652_v33, %v2449_v8  ;;  %v774_v42 = vmul.f32 0.5, %v758_v19  ;;  %820 = vadd.xlane.f32.xlu0 %v804_v35 }
 0x1e3   : > { %v1750_v31 = vpop.eup %1749  ;;  %1769 = vtanh.f32 %v722_v29  ;;  %v654_v40 = vpop.f32.mrb[13].mxu0  ;;  %v693_v51 = vadd.f32 %v692_v34, %v2449_v8 }
 0x1e4   : > { %v1752_v37 = vpop.eup %1751  ;;  %v751_v38 = vadd.f32 1.0, %v1750_v31  ;;  %v694_v41 = vpop.f32.mrb[13].mxu1  ;;  %1771 = vtanh.f32 %v730_v32  ;;  %v655_v45 = vadd.f32 %v654_v40, %v2451_v9  ;;  %v790_v1 = vmul.f32 %v2471_v62, %v774_v42 }
 0x1e5   : > { %v1754_v43 = vpop.eup %1753  ;;  %v759_v44 = vadd.f32 1.0, %v1752_v37  ;;  %v695_v46 = vadd.f32 %v694_v41, %v2451_v9  ;;  %v656_v47 = vpop.f32.mrb[14].mxu0  ;;  %1773 = vtanh.f32 %v687_v28  ;;  %v805_v28 = vmul.f32 %v2479_v22, %v782_v36 }
 0x1e6   : > { %v696_v48 = vpop.f32.mrb[14].mxu1  ;;  %v1756_v49 = vpop.eup %1755  ;;  %v767_v50 = vmul.f32 0.5, %v751_v38  ;;  %1775 = vtanh.f32 %v653_v39  ;;  %v723_v56 = vmul.f32 0.5, %v655_v45  ;;  %v657_v57 = vadd.f32 %v656_v47, %v2449_v8  ;;  %836 = vadd.xlane.f32.xlu0 %v812_v11 }
 0x1e7   : > { %v698_v52 = vpop.f32.mrb[15].mxu1  ;;  %v658_v53 = vpop.f32.mrb[15].mxu0  ;;  %v752_v55 = vadd.f32 1.0, %v1756_v49  ;;  %v775_v59 = vmul.f32 0.5, %v759_v44  ;;  %v731_v61 = vmul.f32 0.5, %v695_v46  ;;  %v813_v13 = vmul.f32 %v2479_v22, %v790_v1 }
 0x1e8   : > { %v1758_v54 = vpop.eup %1757  ;;  %v699_v63 = vadd.f32 %v698_v52, %v2451_v9  ;;  %1777 = vtanh.f32 %v723_v56  ;;  %v659_v2 = vadd.f32 %v658_v53, %v2451_v9  ;;  %v783_v15 = vmul.f32 %v2476_v18, %v767_v50 }
 0x1e9   : > { %v1760_v58 = vpop.eup %1759  ;;  %v760_v60 = vadd.f32 1.0, %v1758_v54  ;;  %v768_v0 = vmul.f32 0.5, %v752_v55  ;;  %1779 = vtanh.f32 %v731_v61  ;;  %v697_v19 = vadd.f32 %v696_v48, %v2449_v8  ;;  %838 = vadd.xlane.f32.xlu1 %v813_v13 }
 0x1ea   : > { %v1762_v6 = vpop.eup %1761  ;;  %v732_v10 = vmul.f32 0.5, %v699_v63  ;;  %1781 = vtanh.f32 %v693_v51  ;;  %v724_v14 = vmul.f32 0.5, %v659_v2  ;;  %v806_v21 = vmul.f32 %v2479_v22, %v783_v15  ;;  %822 = vadd.xlane.f32.xlu0 %v805_v28 }
 0x1eb   : > { %v776_v7 = vmul.f32 0.5, %v760_v60  ;;  %v1764_v12 = vpop.eup %1763  ;;  %v784_v9 = vmul.f32 %v1748_v27, %v768_v0  ;;  %v791_v24 = vmul.f32 %v2481_v23, %v775_v59 }
 0x1ec   : > { %v1766_v16 = vpop.eup %1765  ;;  %v753_v17 = vadd.f32 1.0, %v1764_v12  ;;  %1783 = vtanh.f32 %v732_v10  ;;  %v2098_v10 = vmov 0  }
 0x1ed   : > { %v1768_v62 = vpop.eup %1767  ;;  %v761_v20 = vadd.f32 1.0, %v1766_v16  ;;  %1785 = vtanh.f32 %v724_v14  ;;  %v792_v18 = vmul.f32 %v1754_v43, %v776_v7  ;;  %824 = vadd.xlane.f32.xlu1 %v806_v21  ;;  %v814_v23 = vmul.f32 %v2479_v22, %v791_v24  ;;  %1661 = vset.pattern.permute.xlu0 %v2098_v10 }
 0x1ee   : > { %v1770_v25 = vpop.eup %1769  ;;  %v769_v26 = vmul.f32 0.5, %v753_v17  ;;  %1787 = vtanh.f32 %v697_v19  ;;  %v807_v36 = vmul.f32 %v2479_v22, %v784_v9  ;;  %1662 = vset.pattern.permute.xlu1 %v2098_v10  ;;  %v859_v16 = vadd.s32 40, %v2442_v4 }
 0x1ef   : > { %v1772_v29 = vpop.eup %1771  ;;  %v777_v30 = vmul.f32 0.5, %v761_v20  ;;  %v754_v31 = vadd.f32 1.0, %v1770_v25  ;;  %1789 = vtanh.f32 %v657_v57  ;;  %840 = vadd.xlane.f32.xlu0 %v814_v23  ;;  %v815_v51 = vmul.f32 %v2479_v22, %v792_v18 }
 0x1f0   : > { %v1774_v8 = vpop.eup %1773  ;;  %v762_v32 = vadd.f32 1.0, %v1772_v29  ;;  %v785_v27 = vmul.f32 %v1760_v58, %v769_v26  ;;  %v863_v17 = vadd.s32 72, %v2442_v4  ;;  %v855_v9 = vadd.s32 8, %v2442_v4 }
 0x1f1   : > { %v1776_v33 = vpop.eup %1775  ;;  %v770_v34 = vmul.f32 0.5, %v754_v31  ;;  %v793_v35 = vmul.f32 %v1762_v6, %v777_v30  ;;  %826 = vadd.xlane.f32.xlu1 %v807_v36  ;;  %v858_v20 = vadd.s32 32, %v2442_v4  ;;  %v860_v21 = vadd.s32 48, %v2442_v4 }
 0x1f2   : > { %v778_v37 = vmul.f32 0.5, %v762_v32  ;;  %v1778_v38 = vpop.eup %1777  ;;  %v808_v42 = vmul.f32 %v2479_v22, %v785_v27  ;;  %v862_v24 = vadd.s32 64, %v2442_v4  ;;  %v856_v25 = vadd.s32 16, %v2442_v4 }
 0x1f3   : > { %v786_v39 = vmul.f32 %v1768_v62, %v770_v34  ;;  %v1780_v40 = vpop.eup %1779  ;;  %v755_v41 = vadd.f32 1.0, %v1778_v38  ;;  %v816_v58 = vmul.f32 %v2479_v22, %v793_v35  ;;  %v2529_v30 = vstv %s887_s7 }
 0x1f4   : > { %v794_v43 = vmul.f32 %v1774_v8, %v778_v37  ;;  %v1782_v44 = vpop.eup %1781  ;;  %v763_v45 = vadd.f32 1.0, %v1780_v40  ;;  %828 = vadd.xlane.f32.xlu0 %v808_v42  ;;  %v857_v8 = vadd.s32 24, %v2442_v4  ;;  %v867_v34 = vadd.s32 104, %v2442_v4 }
 0x1f5   : > { %v771_v47 = vmul.f32 0.5, %v755_v41  ;;  %842 = vadd.xlane.f32.xlu1 %v815_v51  ;;  %v809_v60 = vmul.f32 %v2479_v22, %v786_v39  ;;  %v861_v38 = vadd.s32 56, %v2442_v4  ;;  %v865_v36 = vadd.s32 88, %v2442_v4 }
 0x1f6   : > { %v1784_v46 = vpop.eup %1783  ;;  %v779_v49 = vmul.f32 0.5, %v763_v45  ;;  %v817_v1 = vmul.f32 %v2479_v22, %v794_v43  ;;  %v866_v39 = vadd.s32 96, %v2442_v4  ;;  %v868_v43 = vadd.s32 112, %v2442_v4 }
 0x1f7   : > { %v1786_v48 = vpop.eup %1785  ;;  %v764_v50 = vadd.f32 1.0, %v1784_v46  ;;  %v787_v53 = vmul.f32 %v1776_v33, %v771_v47  ;;  %v864_v33 = vadd.s32 80, %v2442_v4 }
 0x1f8   : > { %v756_v52 = vadd.f32 1.0, %v1786_v48  ;;  %v795_v55 = vmul.f32 %v1782_v44, %v779_v49  ;;  %v1788_v56 = vpop.eup %1787  ;;  %844 = vadd.xlane.f32.xlu0 %v816_v58  ;;  %v869_v48 = vadd.s32 120, %v2442_v4 }
 0x1f9   : > { %v780_v54 = vmul.f32 0.5, %v764_v50  ;;  %v1790_v59 = vpop.eup %1789  ;;  %v810_v63 = vmul.f32 %v2479_v22, %v787_v53  ;;  %830 = vadd.xlane.f32.xlu1 %v809_v60 }
 0x1fa   : > { %v772_v57 = vmul.f32 0.5, %v756_v52  ;;  %v818_v2 = vmul.f32 %v2479_v22, %v795_v55 }
 0x1fb   : > { %v796_v61 = vmul.f32 %v1788_v56, %v780_v54 }
 0x1fc   : > { %v788_v0 = vmul.f32 %v1790_v59, %v772_v57  ;;  %832 = vadd.xlane.f32.xlu0 %v810_v63 }
 0x1fd   : > { %846 = vadd.xlane.f32.xlu1 %v817_v1  ;;  %v819_v7 = vmul.f32 %v2479_v22, %v796_v61 }
 0x1fe   : > { %v811_v6 = vmul.f32 %v2479_v22, %v788_v0  ;;  %v870_v22 = vstv %s1480_s30 }
 0x1ff   : > { %v876_v26 = vadd.s32 %v870_v22, %v859_v16  ;;  %v871_v28 = vadd.s32 %v870_v22, %v2442_v4  ;;  %v880_v18 = vadd.s32 %v870_v22, %v863_v17  ;;  %v872_v31 = vadd.s32 %v870_v22, %v855_v9 }
 0x200   : > { %848 = vadd.xlane.f32.xlu0 %v818_v2  ;;  %v875_v27 = vadd.s32 %v870_v22, %v858_v20  ;;  %v877_v35 = vadd.s32 %v870_v22, %v860_v21  ;;  %v879_v37 = vadd.s32 %v870_v22, %v862_v24  ;;  %v873_v23 = vadd.s32 %v870_v22, %v856_v25 }
 0x201   : > { %834 = vadd.xlane.f32.xlu1 %v811_v6  ;;  %vm894_vm2 = vcmp.lt.s32.totalorder %v876_v26, %v2529_v30  ;;  %vm889_vm3 = vcmp.lt.s32.totalorder %v871_v28, %v2529_v30  ;;  %vm898_vm4 = vcmp.lt.s32.totalorder %v880_v18, %v2529_v30  ;;  %vm890_vm5 = vcmp.lt.s32.totalorder %v872_v31, %v2529_v30 }
 0x202   : > { %v874_v41 = vadd.s32 %v870_v22, %v857_v8  ;;  %vm893_vm6 = vcmp.lt.s32.totalorder %v875_v27, %v2529_v30  ;;  %v881_v44 = vadd.s32 %v870_v22, %v864_v33  ;;  %v884_v46 = vadd.s32 %v870_v22, %v867_v34  ;;  %v2600_v33 = vld [vmem:[#allocation2] sm:$0x1] }
 0x203   : > { %vm895_vm7 = vcmp.lt.s32.totalorder %v877_v35, %v2529_v30  ;;  %vm897_vm8 = vcmp.lt.s32.totalorder %v879_v37, %v2529_v30  ;;  %vm891_vm9 = vcmp.lt.s32.totalorder %v873_v23, %v2529_v30  ;;  %v878_v47 = vadd.s32 %v870_v22, %v861_v38 }
 0x204   : > { %v882_v50 = vadd.s32 %v870_v22, %v865_v36  ;;  %v883_v52 = vadd.s32 %v870_v22, %v866_v39  ;;  %vm892_vm10 = vcmp.lt.s32.totalorder %v874_v41, %v2529_v30  ;;  %v885_v57 = vadd.s32 %v870_v22, %v868_v43 }
 0x205   : > { %850 = vadd.xlane.f32.xlu1 %v819_v7  ;;  %vm899_vm11 = vcmp.lt.s32.totalorder %v881_v44, %v2529_v30  ;;  %vm902_vm12 = vcmp.lt.s32.totalorder %v884_v46, %v2529_v30  ;;  %vm896_vm13 = vcmp.lt.s32.totalorder %v878_v47, %v2529_v30  ;;  %v886_v63 = vadd.s32 %v870_v22, %v869_v48 }
 0x206   : > { %vm900_vm14 = vcmp.lt.s32.totalorder %v882_v50, %v2529_v30  ;;  %vm901_vm15 = vcmp.lt.s32.totalorder %v883_v52, %v2529_v30  ;;  %vm903_vm0 = vcmp.lt.s32.totalorder %v885_v57, %v2529_v30 }
 0x207   : > { %vm904_vm1 = vcmp.lt.s32.totalorder %v886_v63, %v2529_v30 }
 0x26f   : > { %v821_v11 = vpop.xlane.xlu0 %820 }
 0x270   : > { %v905_v58 = vsel %vm889_vm3, %v821_v11, -1e+30  ;;  %vm1003_vm3 = vcmask 7168  }
 0x273   : > { %v2512_v12 = vpop.xlane.xlu0 %836 }
 0x274   : > { %v2575_v1 = vsel %vm897_vm8, %v2512_v12, -1e+30 }
 0x276   : > { %v2514_v13 = vpop.xlane.xlu1 %838 }
 0x277   : > { %v823_v14 = vpop.xlane.xlu0 %822  ;;  %v2568_v0 = vsel %vm898_vm4, %v2514_v13, -1e+30  ;;  %vm1262_vm4 = vcmp.lt.s32.totalorder %v338_v3, 256 }
 0x278   : > { %v2549_v49 = vsel %vm890_vm5, %v823_v14, -1e+30 }
 0x27a   : > { %v825_v15 = vpop.xlane.xlu1 %824 }
 0x27b   : > { %v907_v59 = vsel %vm891_vm9, %v825_v15, -1e+30 }
 0x27c   : > { %v2519_v19 = vpop.xlane.xlu0 %840 }
 0x27d   : > { %v2578_v2 = vsel %vm899_vm11, %v2519_v19, -1e+30 }
 0x27e   : > { %v2522_v62 = vpop.xlane.xlu1 %826 }
 0x27f   : > { %v908_v11 = vsel %vm892_vm10, %v2522_v62, -1e+30 }
 0x281   : > { %v829_v29 = vpop.xlane.xlu0 %828 }
 0x282   : > { %v843_v32 = vpop.xlane.xlu1 %842  ;;  %v2551_v51 = vsel %vm893_vm6, %v829_v29, -1e+30 }
 0x283   : > { %v922_v60 = vmax.f32 %v905_v58, %v2551_v51  ;;  %v916_v17 = vsel %vm900_vm14, %v843_v32, -1e+30 }
 0x285   : > { %v845_v40 = vpop.xlane.xlu0 %844  ;;  %v926_v15 = vmax.f32 %v922_v60, %v2575_v1 }
 0x286   : > { %v831_v42 = vpop.xlane.xlu1 %830  ;;  %v2590_v19 = vsel %vm901_vm15, %v845_v40, -1e+30 }
 0x287   : > { %v2543_v45 = vsel %vm894_vm2, %v831_v42, -1e+30  ;;  %v930_v24 = vmax.f32 %v926_v15, %v2590_v19  ;;  %vm1042_vm2 = vcmask 0  }
 0x288   : > { %v923_v54 = vmax.f32 %v2549_v49, %v2543_v45 }
 0x289   : > { %v833_v53 = vpop.xlane.xlu0 %832 }
 0x28a   : > { %v847_v55 = vpop.xlane.xlu1 %846  ;;  %v2556_v56 = vsel %vm895_vm7, %v833_v53, -1e+30  ;;  %v927_v6 = vmax.f32 %v923_v54, %v2568_v0 }
 0x28b   : > { %v924_v61 = vmax.f32 %v907_v59, %v2556_v56  ;;  %v2585_v13 = vsel %vm902_vm12, %v847_v55, -1e+30 }
 0x28c   : > { %v931_v9 = vmax.f32 %v927_v6, %v2585_v13 }
 0x28d   : > { %v849_v10 = vpop.xlane.xlu0 %848  ;;  %v928_v16 = vmax.f32 %v924_v61, %v2578_v2 }
 0x28e   : > { %v835_v7 = vpop.xlane.xlu1 %834  ;;  %v2592_v22 = vsel %vm903_vm0, %v849_v10, -1e+30  ;;  %v934_v28 = vmax.f32 %v930_v24, %v931_v9 }
 0x28f   : > { %v912_v14 = vsel %vm896_vm13, %v835_v7, -1e+30  ;;  %v932_v25 = vmax.f32 %v928_v16, %v2592_v22 }
 0x290   : > { %v925_v12 = vmax.f32 %v908_v11, %v912_v14 }
 0x292   : > { %v929_v20 = vmax.f32 %v925_v12, %v916_v17  ;;  %v851_v21 = vpop.xlane.xlu1 %850 }
 0x293   : > { %v2595_v62 = vsel %vm904_vm1, %v851_v21, -1e+30 }
 0x294   : > { %v933_v26 = vmax.f32 %v929_v20, %v2595_v62 }
 0x296   : > { %v935_v18 = vmax.f32 %v932_v25, %v933_v26 }
 0x298   : > { %v936_v29 = vmax.f32 %v934_v28, %v935_v18 }
 0x29a   : > { %v937_v30 = vrot.slane %v936_v29, 4 }
 0x29c   : > { %v938_v31 = vmax.f32 %v936_v29, %v937_v30 }
 0x29e   : > { %v939_v8 = vrot.slane %v938_v31, 2 }
 0x2a0   : > { %v940_v32 = vmax.f32 %v938_v31, %v939_v8 }
 0x2a2   : > { %v941_v27 = vrot.slane %v940_v32, 1 }
 0x2a4   : > { %v942_v34 = vmax.f32 %v940_v32, %v941_v27 }
 0x2a6   : > { %v2603_v35 = vmax.f32 %v2600_v33, %v942_v34 }
 0x2a8   : > { %v2607_v37 = vrot.slane %v2603_v35, %v2445_v5  ;;  %1265 = vst.msk [vmem:[#allocation2] sm:$0x1] %vm1042_vm2, %v2603_v35 }
 0x2aa   : > { %v953_v23 = vsub.f32 %v905_v58, %v2607_v37  ;;  %v954_v38 = vsub.f32 %v2549_v49, %v2607_v37  ;;  %v955_v36 = vsub.f32 %v907_v59, %v2607_v37  ;;  %v956_v39 = vsub.f32 %v908_v11, %v2607_v37 }
 0x2ab   : > { %v957_v40 = vsub.f32 %v2551_v51, %v2607_v37  ;;  %v958_v43 = vsub.f32 %v2543_v45, %v2607_v37  ;;  %v959_v47 = vsub.f32 %v2556_v56, %v2607_v37  ;;  %v962_v48 = vsub.f32 %v2568_v0, %v2607_v37 }
 0x2ac   : > { %v969_v41 = vmul.f32 1.442695, %v953_v23  ;;  %v971_v42 = vmul.f32 1.442695, %v954_v38  ;;  %v973_v44 = vmul.f32 1.442695, %v955_v36  ;;  %v960_v50 = vsub.f32 %v912_v14, %v2607_v37 }
 0x2ad   : > { %v975_v46 = vmul.f32 1.442695, %v956_v39  ;;  %v977_v49 = vmul.f32 1.442695, %v957_v40  ;;  %v979_v51 = vmul.f32 1.442695, %v958_v43  ;;  %v961_v52 = vsub.f32 %v2575_v1, %v2607_v37 }
 0x2ae   : > { %1791 = vpow2.f32 %v969_v41  ;;  %v981_v45 = vmul.f32 1.442695, %v959_v47  ;;  %v964_v53 = vsub.f32 %v916_v17, %v2607_v37  ;;  %v987_v54 = vmul.f32 1.442695, %v962_v48 }
 0x2af   : > { %1793 = vpow2.f32 %v971_v42  ;;  %v983_v55 = vmul.f32 1.442695, %v960_v50  ;;  %v963_v56 = vsub.f32 %v2578_v2, %v2607_v37  ;;  %v985_v57 = vmul.f32 1.442695, %v961_v52 }
 0x2b0   : > { %1795 = vpow2.f32 %v973_v44  ;;  %v966_v58 = vsub.f32 %v2585_v13, %v2607_v37  ;;  %v991_v59 = vmul.f32 1.442695, %v964_v53  ;;  %v965_v1 = vsub.f32 %v2590_v19, %v2607_v37 }
 0x2b1   : > { %1797 = vpow2.f32 %v975_v46  ;;  %v989_v6 = vmul.f32 1.442695, %v963_v56  ;;  %v968_v10 = vsub.f32 %v2595_v62, %v2607_v37  ;;  %v967_v9 = vsub.f32 %v2592_v22, %v2607_v37 }
 0x2b2   : > { %1799 = vpow2.f32 %v977_v49  ;;  %v995_v11 = vmul.f32 1.442695, %v966_v58  ;;  %v993_v16 = vmul.f32 1.442695, %v965_v1  ;;  %v944_v46 = vsub.f32 %v2600_v33, %v2603_v35 }
 0x2b3   : > { %1801 = vpow2.f32 %v979_v51  ;;  %v999_v20 = vmul.f32 1.442695, %v968_v10  ;;  %v997_v29 = vmul.f32 1.442695, %v967_v9 }
 0x2b4   : > { %1803 = vpow2.f32 %v981_v45  ;;  %v945_v52 = vmul.f32 1.442695, %v944_v46 }
 0x2b5   : > { %1805 = vpow2.f32 %v987_v54 }
 0x2b6   : > { %1807 = vpow2.f32 %v983_v55 }
 0x2b7   : > { %1809 = vpow2.f32 %v985_v57 }
 0x2b8   : > { %v1792_v60 = vpop.eup %1791  ;;  %1811 = vpow2.f32 %v991_v59 }
 0x2b9   : > { %v1794_v61 = vpop.eup %1793  ;;  %v1004_v63 = vsel %vm1003_vm3, %v1792_v60, 0.0  ;;  %1089 = vperm.xlu0 %1661, %v1792_v60   ;;  %1813 = vpow2.f32 %v989_v6 }
 0x2ba   : > { %v1796_v0 = vpop.eup %1795  ;;  %v1005_v2 = vsel %vm1003_vm3, %v1794_v61, 0.0  ;;  %1094 = vperm.xlu1 %1662, %v1794_v61   ;;  %1815 = vpow2.f32 %v995_v11  ;;  %v1001_v61 = vld [vmem:[#allocation3] sm:$0x1]  ;;  %v1825_v11 = vld [vmem:[%s2388_s3 + $0x8] sm:$0xff] }
 0x2bb   : > { %v1798_v7 = vpop.eup %1797  ;;  %v1006_v13 = vadd.f32 %v1005_v2, %v1004_v63  ;;  %v1007_v14 = vsel %vm1003_vm3, %v1796_v0, 0.0  ;;  %1817 = vpow2.f32 %v993_v16 }
 0x2bc   : > { %v1800_v15 = vpop.eup %1799  ;;  %v1009_v17 = vsel %vm1003_vm3, %v1798_v7, 0.0  ;;  %1819 = vpow2.f32 %v999_v20 }
 0x2bd   : > { %v1008_v12 = vadd.f32 %v1007_v14, %v1006_v13  ;;  %v1802_v19 = vpop.eup %1801  ;;  %v1011_v24 = vsel %vm1003_vm3, %v1800_v15, 0.0  ;;  %1821 = vpow2.f32 %v997_v29  ;;  %v1057_v13 = vunpack.c.l.bf16 %v1825_v11 }
 0x2be   : > { %1099 = vperm.xlu1 %1662, %v1796_v0   ;;  %v1804_v62 = vpop.eup %1803  ;;  %v1013_v28 = vsel %vm1003_vm3, %v1802_v19, 0.0  ;;  %1823 = vpow2.f32 %v945_v52  ;;  %v1058_v14 = vunpack.c.h.bf16 %v1825_v11 }
 0x2bf   : > { %v1010_v21 = vadd.f32 %v1009_v17, %v1008_v12  ;;  %v1806_v25 = vpop.eup %1805  ;;  %v1015_v22 = vsel %vm1003_vm3, %v1804_v62, 0.0 }
 0x2c0   : > { %1134 = vperm.xlu0 %1661, %v1806_v25   ;;  %v1808_v18 = vpop.eup %1807  ;;  %v1021_v39 = vsel %vm1003_vm3, %v1806_v25, 0.0 }
 0x2c1   : > { %v1012_v26 = vadd.f32 %v1011_v24, %v1010_v21  ;;  %v1810_v31 = vpop.eup %1809  ;;  %v1017_v27 = vsel %vm1003_vm3, %v1808_v18, 0.0  ;;  %v1828_v21 = vld [vmem:[%s2388_s3 + $0x18] sm:$0xff] }
 0x2c2   : > { %1104 = vperm.xlu1 %1662, %v1798_v7   ;;  %v1812_v8 = vpop.eup %1811  ;;  %v1019_v23 = vsel %vm1003_vm3, %v1810_v31, 0.0  ;;  %v1062_v24 = vunpack.c.h.bf16 %v1828_v21 }
 0x2c3   : > { %v1014_v30 = vadd.f32 %v1013_v28, %v1012_v26  ;;  %v1814_v37 = vpop.eup %1813  ;;  %v1025_v47 = vsel %vm1003_vm3, %v1812_v8, 0.0 }
 0x2c4   : > { %1144 = vperm.xlu0 %1661, %v1812_v8   ;;  %v1816_v38 = vpop.eup %1815  ;;  %v1023_v42 = vsel %vm1003_vm3, %v1814_v37, 0.0 }
 0x2c5   : > { %v1016_v32 = vadd.f32 %v1015_v22, %v1014_v30  ;;  %v1818_v41 = vpop.eup %1817  ;;  %v1029_v45 = vsel %vm1003_vm3, %v1816_v38, 0.0  ;;  %v1829_v22 = vld [vmem:[%s2388_s3 + $0x20] sm:$0xff] }
 0x2c6   : > { %1109 = vperm.xlu1 %1662, %v1800_v15   ;;  %v1820_v43 = vpop.eup %1819  ;;  %v1027_v49 = vsel %vm1003_vm3, %v1818_v41, 0.0  ;;  %v1826_v15 = vld [vmem:[%s2388_s3] sm:$0xff]  ;;  %v1063_v8 = vunpack.c.l.bf16 %v1829_v22 }
 0x2c7   : > { %v1018_v34 = vadd.f32 %v1017_v27, %v1016_v32  ;;  %v1822_v50 = vpop.eup %1821  ;;  %v1033_v33 = vsel %vm1003_vm3, %v1820_v43, 0.0  ;;  %v1055_v12 = vunpack.c.l.bf16 %v1826_v15  ;;  %v1056_v16 = vunpack.c.h.bf16 %v1826_v15  ;;  %v1830_v27 = vld [vmem:[%s2388_s3 + $0x28] sm:$0xff] }
 0x2c8   : > { %1154 = vperm.xlu0 %1661, %v1816_v38   ;;  %v1031_v54 = vsel %vm1003_vm3, %v1822_v50, 0.0  ;;  %v1824_v60 = vpop.eup %1823  ;;  %v1064_v32 = vunpack.c.h.bf16 %v1829_v22  ;;  %v1837_v22 = vld [vmem:[%s2388_s3 + $0x60] sm:$0xff] }
 0x2c9   : > { %v1020_v36 = vadd.f32 %v1019_v23, %v1018_v34  ;;  %v1002_v0 = vmul.f32 %v1824_v60, %v1001_v61  ;;  %v1065_v34 = vunpack.c.l.bf16 %v1830_v27 }
 0x2ca   : > { %1114 = vperm.xlu1 %1662, %v1802_v19   ;;  %v1827_v19 = vld [vmem:[%s2388_s3 + $0x10] sm:$0xff] }
 0x2cb   : > { %v1022_v40 = vadd.f32 %v1021_v39, %v1020_v36  ;;  %v1059_v9 = vunpack.c.l.bf16 %v1827_v19  ;;  %v1060_v20 = vunpack.c.h.bf16 %v1827_v19 }
 0x2cc   : > { %1164 = vperm.xlu0 %1661, %v1820_v43  }
 0x2cd   : > { %v1024_v44 = vadd.f32 %v1023_v42, %v1022_v40 }
 0x2ce   : > { %1119 = vperm.xlu1 %1662, %v1804_v62   ;;  %v1061_v62 = vunpack.c.l.bf16 %v1828_v21 }
 0x2cf   : > { %v1026_v48 = vadd.f32 %v1025_v47, %v1024_v44 }
 0x2d1   : > { %v1028_v51 = vadd.f32 %v1027_v49, %v1026_v48 }
 0x2d2   : > { %1124 = vperm.xlu1 %1662, %v1808_v18  }
 0x2d3   : > { %v1030_v53 = vadd.f32 %v1029_v45, %v1028_v51 }
 0x2d5   : > { %v1032_v55 = vadd.f32 %v1031_v54, %v1030_v53 }
 0x2d6   : > { %1129 = vperm.xlu1 %1662, %v1810_v31  }
 0x2d7   : > { %v1034_v35 = vadd.f32 %v1033_v33, %v1032_v55 }
 0x2d9   : > { %v1035_v56 = vrot.slane %v1034_v35, 4 }
 0x2da   : > { %1139 = vperm.xlu1 %1662, %v1814_v37   ;;  %v1066_v37 = vunpack.c.h.bf16 %v1830_v27 }
 0x2db   : > { %v1036_v57 = vadd.f32 %v1035_v56, %v1034_v35 }
 0x2dd   : > { %v1037_v58 = vrot.slane %v1036_v57, 2 }
 0x2de   : > { %1149 = vperm.xlu1 %1662, %v1818_v41   ;;  %v1831_v41 = vld [vmem:[%s2388_s3 + $0x30] sm:$0xff] }
 0x2df   : > { %v1038_v59 = vadd.f32 %v1037_v58, %v1036_v57  ;;  %v1067_v42 = vunpack.c.l.bf16 %v1831_v41  ;;  %v1068_v43 = vunpack.c.h.bf16 %v1831_v41 }
 0x2e1   : > { %v1039_v63 = vrot.slane %v1038_v59, 1 }
 0x2e2   : > { %1159 = vperm.xlu1 %1662, %v1822_v50   ;;  %v1832_v50 = vld [vmem:[%s2388_s3 + $0x38] sm:$0xff] }
 0x2e3   : > { %v1040_v1 = vadd.f32 %v1039_v63, %v1038_v59  ;;  %v1069_v51 = vunpack.c.l.bf16 %v1832_v50  ;;  %v1070_v52 = vunpack.c.h.bf16 %v1832_v50 }
 0x2e5   : > { %v1041_v6 = vadd.f32 %v1040_v1, %v1002_v0 }
 0x2e6   : > { %1047 = vperm.xlu1 %1662, %v1824_v60   ;;  %v1833_v60 = vld [vmem:[%s2388_s3 + $0x40] sm:$0xff] }
 0x2e7   : > { %1043 = vst.msk [vmem:[#allocation3] sm:$0x1] %vm1042_vm2, %v1041_v6  ;;  %v1071_v61 = vunpack.c.l.bf16 %v1833_v60  ;;  %v1072_v63 = vunpack.c.h.bf16 %v1833_v60 }
 0x338   : > { %v1090_v17 = vpop.permute.xlu0 %1089 }
 0x339   : > { %v1095_v2 = vpop.permute.xlu1 %1094  ;;  %v1167_v18 = vmul.f32 %v1090_v17, %v1055_v12  ;;  %v1168_v29 = vmul.f32 %v1090_v17, %v1056_v16  ;;  %v1835_v16 = vld [vmem:[%s2388_s3 + $0x50] sm:$0xff] }
 0x33a   : > { %v1169_v26 = vmul.f32 %v1095_v2, %v1057_v13  ;;  %v1170_v28 = vmul.f32 %v1095_v2, %v1058_v14  ;;  %v1075_v17 = vunpack.c.l.bf16 %v1835_v16  ;;  %v1076_v19 = vunpack.c.h.bf16 %v1835_v16 }
 0x33b   : > { %v2099_v16 = vmov 1966171168  }
 0x33c   : > { %v1199_v38 = vadd.f32 %v1169_v26, %v1167_v18  ;;  %v1220_v36 = vadd.f32 %v1170_v28, %v1168_v29 }
 0x33d   : > { %v1100_v7 = vpop.permute.xlu1 %1099 }
 0x33e   : > { %v1171_v30 = vmul.f32 %v1100_v7, %v1059_v9  ;;  %v1172_v31 = vmul.f32 %v1100_v7, %v1060_v20  ;;  %v1834_v7 = vld [vmem:[%s2388_s3 + $0x48] sm:$0xff] }
 0x33f   : > { %v1135_v33 = vpop.permute.xlu0 %1134  ;;  %v1074_v11 = vunpack.c.h.bf16 %v1834_v7 }
 0x340   : > { %v1200_v44 = vadd.f32 %v1199_v38, %v1171_v30  ;;  %v1221_v46 = vadd.f32 %v1220_v36, %v1172_v31  ;;  %v1838_v38 = vld [vmem:[%s2388_s3 + $0x68] sm:$0xff] }
 0x341   : > { %v1105_v10 = vpop.permute.xlu1 %1104  ;;  %v1186_v18 = vmul.f32 %v1135_v33, %v1074_v11  ;;  %v1081_v36 = vunpack.c.l.bf16 %v1838_v38 }
 0x342   : > { %v1173_v39 = vmul.f32 %v1105_v10, %v1061_v62  ;;  %v1174_v40 = vmul.f32 %v1105_v10, %v1062_v24  ;;  %v1073_v10 = vunpack.c.l.bf16 %v1834_v7  ;;  %v1836_v24 = vld [vmem:[%s2388_s3 + $0x58] sm:$0xff] }
 0x343   : > { %v1145_v15 = vpop.permute.xlu0 %1144  ;;  %v1078_v26 = vunpack.c.h.bf16 %v1836_v24 }
 0x344   : > { %v1201_v45 = vadd.f32 %v1200_v44, %v1173_v39  ;;  %v1222_v53 = vadd.f32 %v1221_v46, %v1174_v40  ;;  %v1185_v28 = vmul.f32 %v1135_v33, %v1073_v10  ;;  %v1082_v39 = vunpack.c.h.bf16 %v1838_v38 }
 0x345   : > { %v1110_v25 = vpop.permute.xlu1 %1109 }
 0x346   : > { %v1175_v47 = vmul.f32 %v1110_v25, %v1063_v8  ;;  %v1176_v48 = vmul.f32 %v1110_v25, %v1064_v32  ;;  %v1077_v25 = vunpack.c.l.bf16 %v1836_v24  ;;  %v1079_v8 = vunpack.c.l.bf16 %v1837_v22 }
 0x347   : > { %v1080_v32 = vunpack.c.h.bf16 %v1837_v22  ;;  %v1155_v40 = vpop.permute.xlu0 %1154  ;;  %v1044_v22 = vld [vmem:[#allocation4] sm:$0x3] }
 0x348   : > { %v1202_v35 = vadd.f32 %v1201_v45, %v1175_v47  ;;  %v1223_v56 = vadd.f32 %v1222_v53, %v1176_v48  ;;  %v1189_v41 = vmul.f32 %v1145_v15, %v1077_v25  ;;  %v1839_v47 = vld [vmem:[%s2388_s3 + $0x70] sm:$0xff]  ;;  %v1840_v53 = vld [vmem:[%s2388_s3 + $0x78] sm:$0xff]  ;;  %v1193_v33 = vmul.f32 %v1155_v40, %v1081_v36 }
 0x349   : > { %v1115_v23 = vpop.permute.xlu1 %1114  ;;  %v1083_v48 = vunpack.c.l.bf16 %v1839_v47 }
 0x34a   : > { %v1177_v54 = vmul.f32 %v1115_v23, %v1065_v34  ;;  %v1178_v55 = vmul.f32 %v1115_v23, %v1066_v37 }
 0x34c   : > { %v1203_v0 = vadd.f32 %v1202_v35, %v1177_v54  ;;  %v1224_v1 = vadd.f32 %v1223_v56, %v1178_v55  ;;  %v1085_v54 = vunpack.c.l.bf16 %v1840_v53  ;;  %v1086_v55 = vunpack.c.h.bf16 %v1840_v53 }
 0x34d   : > { %v1120_v49 = vpop.permute.xlu1 %1119  ;;  %v1194_v35 = vmul.f32 %v1155_v40, %v1082_v39 }
 0x34e   : > { %v1179_v57 = vmul.f32 %v1120_v49, %v1067_v42  ;;  %v1180_v58 = vmul.f32 %v1120_v49, %v1068_v43  ;;  %v1190_v42 = vmul.f32 %v1145_v15, %v1078_v26  ;;  %v1084_v49 = vunpack.c.h.bf16 %v1839_v47 }
 0x350   : > { %v1204_v13 = vadd.f32 %v1203_v0, %v1179_v57  ;;  %v1225_v14 = vadd.f32 %v1224_v1, %v1180_v58  ;;  %v1165_v58 = vpop.permute.xlu0 %1164 }
 0x351   : > { %v1125_v59 = vpop.permute.xlu1 %1124  ;;  %v1197_v1 = vmul.f32 %v1165_v58, %v1085_v54 }
 0x352   : > { %v1181_v6 = vmul.f32 %v1125_v59, %v1069_v51  ;;  %v1182_v2 = vmul.f32 %v1125_v59, %v1070_v52 }
 0x354   : > { %v1205_v9 = vadd.f32 %v1204_v13, %v1181_v6  ;;  %v1226_v20 = vadd.f32 %v1225_v14, %v1182_v2  ;;  %v1198_v6 = vmul.f32 %v1165_v58, %v1086_v55 }
 0x355   : > { %v1130_v12 = vpop.permute.xlu1 %1129 }
 0x356   : > { %v1183_v21 = vmul.f32 %v1130_v12, %v1071_v61  ;;  %v1184_v62 = vmul.f32 %v1130_v12, %v1072_v63 }
 0x358   : > { %v1206_v29 = vadd.f32 %v1205_v9, %v1183_v21  ;;  %v1227_v30 = vadd.f32 %v1226_v20, %v1184_v62 }
 0x359   : > { %v1140_v31 = vpop.permute.xlu1 %1139 }
 0x35a   : > { %v1187_v27 = vmul.f32 %v1140_v31, %v1075_v17  ;;  %v1188_v34 = vmul.f32 %v1140_v31, %v1076_v19  ;;  %v1207_v37 = vadd.f32 %v1206_v29, %v1185_v28  ;;  %v1228_v23 = vadd.f32 %v1227_v30, %v1186_v18 }
 0x35b   : > { %v1245_v17 = vunpack.c.l.s4 %v2099_v16 }
 0x35c   : > { %v1208_v43 = vadd.f32 %v1207_v37, %v1187_v27  ;;  %v1229_v44 = vadd.f32 %v1228_v23, %v1188_v34  ;;  %v1271_v37 = vld [vmem:[#allocation3] sm:$0x1] (!%p1481_p2)  ;;  %v2100_v23 = vmov (!%p1481_p2), 0  }
 0x35d   : > { %v1150_v46 = vpop.permute.xlu1 %1149  ;;  %v1246_v62 = vunpack.c.0.s8 %v1245_v17  ;;  %1841 = vset.pattern.permute.xlu0 (!%p1481_p2), %v2100_v23  ;;  %1842 = vrcp.f32 (!%p1481_p2), %v1271_v37 }
 0x35e   : > { %v1191_v50 = vmul.f32 %v1150_v46, %v1079_v8  ;;  %v1192_v51 = vmul.f32 %v1150_v46, %v1080_v32  ;;  %v1209_v52 = vadd.f32 %v1208_v43, %v1189_v41  ;;  %v1230_v45 = vadd.f32 %v1229_v44, %v1190_v42 }
 0x35f   : > { %v1249_v29 = vsub.s32 %v1246_v62, %v2442_v4 }
 0x360   : > { %v1210_v56 = vadd.f32 %v1209_v52, %v1191_v50  ;;  %v1231_v57 = vadd.f32 %v1230_v45, %v1192_v51 }
 0x361   : > { %v1160_v59 = vpop.permute.xlu1 %1159 }
 0x362   : > { %v1195_v60 = vmul.f32 %v1160_v59, %v1083_v48  ;;  %v1196_v61 = vmul.f32 %v1160_v59, %v1084_v49  ;;  %v1211_v63 = vadd.f32 %v1210_v56, %v1193_v33  ;;  %v1232_v0 = vadd.f32 %v1231_v57, %v1194_v35 }
 0x364   : > { %v1212_v2 = vadd.f32 %v1211_v63, %v1195_v60  ;;  %v1233_v7 = vadd.f32 %v1232_v0, %v1196_v61 }
 0x365   : > { %v1048_v26 = vpop.permute.xlu1 %1047 }
 0x366   : > { %v1213_v10 = vadd.f32 %v1212_v2, %v1197_v1  ;;  %v1234_v11 = vadd.f32 %v1233_v7, %v1198_v6  ;;  %v1053_v31 = vrot.slane %v1048_v26, %v2445_v5 }
 0x367   : > { %v1843_v4 = vpop.eup (!%p1481_p2), %1842 }
 0x368   : > { %v1214_v13 = vrot.slane %v1213_v10, 4  ;;  %v1235_v14 = vrot.slane %v1234_v11, 4  ;;  %v1054_v27 = vmul.f32 %v1053_v31, %v1044_v22  ;;  %1275 = vperm.xlu0 (!%p1481_p2), %1841, %v1843_v4  }
 0x36a   : > { %v1215_v15 = vadd.f32 %v1214_v13, %v1213_v10  ;;  %v1236_v12 = vadd.f32 %v1235_v14, %v1234_v11 }
 0x36c   : > { %v1216_v19 = vrot.slane %v1215_v15, 2  ;;  %v1237_v9 = vrot.slane %v1236_v12, 2 }
 0x36e   : > { %v1217_v20 = vadd.f32 %v1216_v19, %v1215_v15  ;;  %v1238_v21 = vadd.f32 %v1237_v9, %v1236_v12 }
 0x370   : > { %v1218_v24 = vrot.slane %v1217_v20, 1  ;;  %v1239_v25 = vrot.slane %v1238_v21, 1 }
 0x372   : > { %v1219_v28 = vadd.f32 %v1218_v24, %v1217_v20  ;;  %v1240_v18 = vadd.f32 %v1239_v25, %v1238_v21 }
 0x374   : > { %v1243_v30 = vcombine.low %v1219_v28, %v1240_v18 }
 0x376   : > { %v1250_v8 = vrot.slane %v1243_v30, %v1249_v29  ;;  %1269 = sbr.rel (%p1481_p2) target bundleno = 1005 (0x3ed), region = 60 }
 0x378   : > { %v1257_v32 = vrot.slane %v1250_v8, %v1249_v29 }
 0x37a   : > { %v1259_v34 = vadd.f32 %v1257_v32, %v1054_v27 }
 0x37c   : > { %1264 = vst.msk [vmem:[#allocation4] sm:$0x3] %vm1262_vm4, %v1259_v34 }
 0x383   : > { %v1270_v36 = vld [vmem:[#allocation4] sm:$0x3] }
 0x3e7   : > { %v1276_v38 = vpop.permute.xlu0 %1275 }
 0x3e8   : > { %v1281_v39 = vrot.slane %v1276_v38, %v2445_v5 }
 0x3ea   : > { %v1282_v40 = vmul.f32 %v1281_v39, %v1270_v36 }
 0x3ec   : > { %1283 = vst.msk [vmem:[%s274_s9] sm:$0x3] %vm1262_vm4, %v1282_v40 }
 0x3ed PF: > { %s2788_s10 = sld [smem:[#allocation21_spill]]  ;;  %s2789_s26 = sld [smem:[#allocation22_spill]] }
 0x3ee   : > { %s2790_s14 = sld [smem:[#allocation27_spill]]  ;;  %s1299_s15 = sshll.u32 %s274_s9, 4  ;;  %s1300_s15 = int_to_ptr.vmem [resolvable:$true] %s1299_s15 }
 0x3ef   : > { %s1285_s16 = scalar_lea.sflag [#allocation9], %s272_s4  ;;  %s1958_s2 = scalar_lea.vmem %s1300_s15, 32 }
 0x3f0   : > { %p1959_p9 = scmp.ne.s32.totalorder %s1300_s15, %s1958_s2  ;;  %s2101_s19 = smov [#allocation15]  }
 0x3f1   : > { %s1962_s13 = sshll.u32 %s2101_s19, 4  ;;  %s1963_s13 = int_to_ptr.vmem [resolvable:$false] %s1962_s13 }
 0x3f2   : > { %s1964_s18 = scalar_lea.vmem %s1963_s13, 64  ;;  %p1965_p8 = scmp.lt.s32.totalorder %s1300_s15, %s1963_s13 }
 0x3f3   : > { %s1488_s23 = sshll.u32 %s2788_s10, 5  ;;  %p2791_p5 = scmp.ne.s32.totalorder %s2789_s26, 0 }
 0x3f4   : > { %s2684_s20 = scalar_lea.hbm %s2790_s14, %s1488_s23  ;;  %p1966_p12 = scmp.lt.s32.totalorder %s1964_s18, %s1958_s2 }
 0x3f5   : > { %p1960_p13 = pnand %p1959_p9, %p2791_p5 }
 0x3f6   : > { %p1967_p4 = por %p1966_p12, %p1965_p8 }
 0x3f7   : > { %p1961_p6 = pneg %p1960_p13 }
 0x3f9   : > { %p1968_p7 = pnand %p1967_p4, %p1961_p6 }
 0x3fb   : > { %1971 = shalt.err (!%p1968_p7)
}
 0x3fc   : > { %s1972_s3 = scalar_lea.hbm %s2684_s20, 32  ;;  %s1976_s9 = scalar_lea.hbm %s2790_s14, 64 }
 0x3fd   : > { %p1973_p3 = scmp.ne.s32.totalorder %s2684_s20, %s1972_s3  ;;  %p1977_p11 = scmp.lt.u32.totalorder %s2684_s20, %s2790_s14 }
 0x3fe   : > { %p1978_p10 = scmp.lt.u32.totalorder %s1976_s9, %s1972_s3  ;;  %p1980_p9 = scmp.lt.u32.totalorder %s1972_s3, %s2684_s20 }
 0x3ff   : > { %p1974_p0 = pnand %p1973_p3, %p2791_p5 }
 0x400   : > { %p1979_p2 = por %p1978_p10, %p1977_p11 }
 0x401   : > { %p1975_p1 = pneg %p1974_p0 }
 0x402   : > { %p1981_p13 = por %p1980_p9, %p1979_p2 }
 0x404   : > { %p1982_p6 = pnand %p1981_p13, %p1975_p1 }
 0x406   : > { %1985 = shalt.err (!%p1982_p6)
}
 0x407   : > { %1535 = dma.vmem_to_hbm [thread:$0]  (%p2791_p5), %s1300_s15, 32, %s2684_s20, %s1285_s16  }
 0x408 PF: > { %s2792_s10 = sld [smem:[#allocation20_spill]]  ;;  %s2793_s23 = sld [smem:[#allocation23_spill]] }
 0x409   : > { %p1562_p8 = scmp.ge.s32.totalorder %s2088_s29, 2 }
 0x40e   : > { %s1311_s8 = sand.u32 1, %s2792_s10   ;;  %p2794_p12 = scmp.ne.s32.totalorder %s2793_s23, 0 }
 0x40f   : > { %s1312_s6 = scalar_lea.sflag [#allocation9], %s1311_s8 }
 0x410   : > { %p1552_p4 = pnand %p1562_p8, %p2794_p12 }
 0x412   : > { %2043 = dma.done.wait (!%p1552_p4), %s1312_s6, 32  }
 0x413   : > { %2045 = vsyncadd (!%p1552_p4), %s1312_s6, 4294967264  ;;  %s24_s29 = sadd.s32 1, %s2088_s29   ;;  %s2795_s15 = smov %s2811_s0 }
 0x414   : > { %p21_p7 = scmp.ge.s32.totalorder %s24_s29, 10   ;;  %s2796_s20 = smov %s2052_s21 }
 0x415   : > { %s2797_s21 = smov %s2056_s22  ;;  %s2798_s22 = smov %s2333_s17 }
 0x416   : > { %s2799_s23 = smov %s2064_s24  ;;  %s2800_s24 = smov %s2068_s25 }
 0x417   : > { %s2801_s25 = smov %s2336_s5  ;;  %s2802_s26 = smov %s2080_s27 }
 0x418   : > { %s2803_s0 = smov %s2084_s28  ;;  %s2804_s27 = smov %s2807_s11 }
 0x419   : > { %s2805_s28 = smov %s2795_s15  ;;  %23 = sbr.rel (!%p21_p7) target bundleno = 17 (0x11), region = 101 }
 0x420   :  { %1317 = vsyncpa [#allocation8], 1 }
 0x421   :  { %1319 = vsyncpa [#allocation8 + $0x1], 1 }
 0x422   :  { %1320 = vsyncpa [#allocation11], 1 }
 0x423   :  { %1321 = vsyncpa [#allocation14], 1 }
 0x424   :  { %1322 = vsyncpa [#allocation9], 1 }
 0x425   :  { %1324 = vsyncpa [#allocation9 + $0x1], 1 }

</bundles_post_ra>
